<compile_context>
chip_gen: v6e
topology: v6e:2x2x1
jax: 0.10.0
libtpu: 0.0.40
codegen_flags: <defaults>
</compile_context>

<pallas_src>
import math
from functools import partial

import jax
import jax.numpy as jnp
from jax.experimental import pallas as pl
from jax.experimental.pallas import tpu as pltpu


# ----------------------------------------------------------------------------
# Helpers
# ----------------------------------------------------------------------------
def _round_up(n, m):
    return ((n + m - 1) // m) * m


def _layer_norm(x, gamma, beta, eps=1e-5):
    mu = jnp.mean(x, axis=-1, keepdims=True)
    var = jnp.mean((x - mu) ** 2, axis=-1, keepdims=True)
    return (x - mu) * jax.lax.rsqrt(var + eps) * gamma + beta


W_ORDER = ("in_wT", "in_b", "out_wT", "out_b",
           "ln1_g", "ln1_b", "ln2_g", "ln2_b",
           "ff1_wT", "ff1_b", "ff2_wT", "ff2_b")


# ----------------------------------------------------------------------------
# Fused encoder-stack kernel: grid = (batch_tiles, n_layers)
# ----------------------------------------------------------------------------
def fused_encoder_kernel(
    x_ref,
    in_wT_ref, in_b_ref, out_wT_ref, out_b_ref,
    ln1_g_ref, ln1_b_ref, ln2_g_ref, ln2_b_ref,
    ff1_wT_ref, ff1_b_ref, ff2_wT_ref, ff2_b_ref,
    o_ref,
    *, nhead,
):
    l = pl.program_id(1)

    # The output block's index map ignores the layer axis, so o_ref stays
    # VMEM-resident across all layers and doubles as the activation carry
    # (no scratch slab, no extra full-tile copy).  HBM writeback happens only
    # when the batch-tile index changes / the grid ends.
    @pl.when(l == 0)
    def _():
        o_ref[...] = x_ref[...]

    Bt, S, D = o_ref.shape
    hd = D // nhead
    M = Bt * S

    x2 = o_ref[...].reshape(M, D)                       # [Bt*S, D] f32 token slab
    xb = x2.astype(jnp.bfloat16)

    # ---- QKV projection: one full-width matmul (K=D), bf16 in / f32 acc ----
    qkv = jnp.dot(xb, in_wT_ref[0],
                  preferred_element_type=jnp.float32) + in_b_ref[0]   # [M, 3D]

    # Causal mask generated in-kernel (pure index arithmetic, no HBM traffic).
    rows = jax.lax.broadcasted_iota(jnp.int32, (S, S), 0)
    cols = jax.lax.broadcasted_iota(jnp.int32, (S, S), 1)
    allowed = (cols <= rows)[None, :, :]                              # [1, S, S]

    # Per-head attention.  Per-head contexts are lane-concatenated and fed
    # through ONE full-K output projection (instead of nhead K=hd matmuls plus
    # nhead [M,D] VALU accumulations).
    # TODO(synk): the sub-128-lane per-head slices of qkv still cost XLU
    # relayouts; at realistic head dims, group heads into 128-lane-wide blocks
    # or relayout qkv head-major once.
    ctx_heads = []
    for h in range(nhead):
        # 1/sqrt(hd) is pre-folded into the Q weight columns (fold_attention_scale).
        q = qkv[:, h * hd:(h + 1) * hd].reshape(Bt, S, hd).astype(jnp.bfloat16)
        k = qkv[:, D + h * hd:D + (h + 1) * hd].reshape(Bt, S, hd).astype(jnp.bfloat16)
        v = qkv[:, 2 * D + h * hd:2 * D + (h + 1) * hd].reshape(Bt, S, hd).astype(jnp.bfloat16)

        s = jnp.einsum("bqd,bkd->bqk", q, k,
                       preferred_element_type=jnp.float32)            # [Bt, S, S]
        s = jnp.where(allowed, s, -1e30)
        s = s - jnp.max(s, axis=-1, keepdims=True)
        p = jnp.exp(s)
        p = p * pl.reciprocal(jnp.sum(p, axis=-1, keepdims=True), approx=True)

        ctx = jnp.einsum("bqk,bkd->bqd", p.astype(jnp.bfloat16), v,
                         preferred_element_type=jnp.float32)          # [Bt, S, hd]
        ctx_heads.append(ctx.reshape(M, hd).astype(jnp.bfloat16))

    ctx_all = jnp.concatenate(ctx_heads, axis=-1)                      # [M, D] bf16
    attn = jnp.dot(ctx_all, out_wT_ref[0],
                   preferred_element_type=jnp.float32) + out_b_ref[0]

    x2 = _layer_norm(x2 + attn, ln1_g_ref[0], ln1_b_ref[0])           # post-norm

    # ---- feed forward (ReLU) ----
    h1 = jnp.dot(x2.astype(jnp.bfloat16), ff1_wT_ref[0],
                 preferred_element_type=jnp.float32) + ff1_b_ref[0]
    h1 = jnp.maximum(h1, 0.0)
    h2 = jnp.dot(h1.astype(jnp.bfloat16), ff2_wT_ref[0],
                 preferred_element_type=jnp.float32) + ff2_b_ref[0]
    x2 = _layer_norm(x2 + h2, ln2_g_ref[0], ln2_b_ref[0])

    # Carry for the next layer; the final layer's store is what reaches HBM.
    o_ref[...] = x2.reshape(Bt, S, D)


def _encoder_vmem_bytes(Bt, S, D, F, nhead):
    """Rough per-grid-step VMEM budget (bytes) for the fused encoder kernel."""
    M = Bt * S
    act = Bt * S * D * 4                                  # one f32 activation slab
    blocks = 3 * act                                      # x block (2-buf) + o block
    weights = 2 * ((3 * D * D + D * D + 2 * D * F) * 2    # bf16 matmul weights, 2-buf
                   + (3 * D + D + 4 * D + F + D) * 4)     # f32 biases + LN params
    inter = (3 * M * D + M * F + Bt * S * S + 4 * M * D) * 4  # qkv / ffn / scores / temps
    return blocks + weights + inter


def encoder_stack(x_bsd, params, nhead, batch_tile=None):
    """Runs all encoder layers in a single pallas_call. x_bsd: [B, S, D] f32.

    batch_tile: number of batch rows per grid step.  Keep = B on v5e/v6e
    (weights are streamed only once); use B//2 on v7x so both TensorCores get
    a 'parallel' batch tile and the 64 MiB VMEM budget is respected.
    """
    B, S, D = x_bsd.shape
    L = params["in_wT"].shape[0]
    F = params["ff1_wT"].shape[2]
    Bt = B if batch_tile is None else batch_tile
    assert B % Bt == 0, (B, Bt)

    weights = [params[k] for k in W_ORDER]
    w_specs = [pl.BlockSpec((1,) + w.shape[1:], lambda bt, l: (l, 0, 0))
               for w in weights]
    x_spec = pl.BlockSpec((Bt, S, D), lambda bt, l: (bt, 0, 0))

    vmem_limit = min(64 << 20, max(32 << 20, 2 * _encoder_vmem_bytes(Bt, S, D, F, nhead)))

    return pl.pallas_call(
        partial(fused_encoder_kernel, nhead=nhead),
        out_shape=jax.ShapeDtypeStruct((B, S, D), jnp.float32),
        grid=(B // Bt, L),
        in_specs=[x_spec] + w_specs,
        out_specs=pl.BlockSpec((Bt, S, D), lambda bt, l: (bt, 0, 0)),
        compiler_params=pltpu.CompilerParams(
            dimension_semantics=("parallel", "arbitrary"),
            vmem_limit_bytes=vmem_limit),
    )(x_bsd, *weights)


# ----------------------------------------------------------------------------
# Final vocab projection, tiled over (seq, vocab); the [B,S,D]->[S,B,V]
# permutation is folded into the BlockSpecs (no standalone XLA transpose).
# ----------------------------------------------------------------------------
def final_linear_kernel(x_ref, wT_ref, b_ref, o_ref):
    # x_ref: [B, TS, D]  ->  rows ordered (s, b) to match the [S, B, V] output.
    b_, ts_, d_ = x_ref.shape
    xt = jnp.transpose(x_ref[...], (1, 0, 2)).reshape(ts_ * b_, d_).astype(jnp.bfloat16)
    y = jnp.dot(xt, wT_ref[...], preferred_element_type=jnp.float32) + b_ref[...]
    o_ref[...] = y.reshape(ts_, b_, y.shape[-1])


def final_linear_bsd(x_bsd, wT, b, *, seq_tile=128, vocab_tile=2048):
    """x_bsd: [B, S, D] f32, wT: [D, V] bf16, b: [1, V] f32 -> [S, B, V] f32."""
    B, S, D = x_bsd.shape
    V = wT.shape[1]

    V128 = _round_up(V, 128)
    TV = min(vocab_tile, V128)                 # lane-dense (multiple of 128) stores
    Vp = _round_up(V, TV)
    S8 = _round_up(S, 8)
    TS = min(seq_tile, S8)
    Sp = _round_up(S, TS)

    x_p = jnp.pad(x_bsd, ((0, 0), (0, Sp - S), (0, 0)))
    wT_p = jnp.pad(wT.astype(jnp.bfloat16), ((0, 0), (0, Vp - V)))
    b_p = jnp.pad(b.astype(jnp.float32), ((0, 0), (0, Vp - V)))

    out = pl.pallas_call(
        final_linear_kernel,
        out_shape=jax.ShapeDtypeStruct((Sp, B, Vp), jnp.float32),
        grid=(Sp // TS, Vp // TV),
        in_specs=[pl.BlockSpec((B, TS, D), lambda i, j: (0, i, 0)),
                  pl.BlockSpec((D, TV), lambda i, j: (0, j)),
                  pl.BlockSpec((1, TV), lambda i, j: (0, j))],
        out_specs=pl.BlockSpec((TS, B, TV), lambda i, j: (i, 0, j)),
        compiler_params=pltpu.CompilerParams(
            dimension_semantics=("parallel", "parallel")),
    )(x_p, wT_p, b_p)
    return out[:S, :, :V]


# ----------------------------------------------------------------------------
# Parameters
# ----------------------------------------------------------------------------
def make_positional_encoding(max_len, d_model):
    position = jnp.arange(max_len, dtype=jnp.float32)[:, None]
    div_term = jnp.exp(jnp.arange(0, d_model, 2, dtype=jnp.float32)
                       * (-math.log(10000.0) / d_model))
    pe = jnp.zeros((max_len, d_model), jnp.float32)
    pe = pe.at[:, 0::2].set(jnp.sin(position * div_term))
    pe = pe.at[:, 1::2].set(jnp.cos(position * div_term))
    return pe                                   # [max_len, d_model]


def init_params(key, ntokens, d_model, nhead, ffn_dim, nlayers, max_len=10000):
    assert d_model % nhead == 0
    initrange = 0.1
    s_attn = 1.0 / math.sqrt(d_model)
    s_ffn = 1.0 / math.sqrt(ffn_dim)
    L = nlayers
    ks = jax.random.split(key, 6)
    k_in, k_out, k_f1, k_f2 = jax.random.split(ks[2], 4)

    def u(k, shape, scale):
        return jax.random.uniform(k, shape, minval=-scale, maxval=scale,
                                  dtype=jnp.float32)

    # Stacked per-layer weights ([L, ...]); matmul operands stored in bf16
    # (MXU-native, halves weight DMA / VMEM footprint), biases + LN params in f32.
    return {
        "embedding": u(ks[0], (ntokens, d_model), initrange),
        "lin_wT": u(ks[1], (d_model, ntokens), initrange).astype(jnp.bfloat16),
        "lin_b": jnp.zeros((1, ntokens), jnp.float32),
        "pe": make_positional_encoding(max_len, d_model),
        "in_wT": u(k_in, (L, d_model, 3 * d_model), s_attn).astype(jnp.bfloat16),
        "in_b": jnp.zeros((L, 1, 3 * d_model), jnp.float32),
        "out_wT": u(k_out, (L, d_model, d_model), s_attn).astype(jnp.bfloat16),
        "out_b": jnp.zeros((L, 1, d_model), jnp.float32),
        "ln1_g": jnp.ones((L, 1, d_model), jnp.float32),
        "ln1_b": jnp.zeros((L, 1, d_model), jnp.float32),
        "ln2_g": jnp.ones((L, 1, d_model), jnp.float32),
        "ln2_b": jnp.zeros((L, 1, d_model), jnp.float32),
        "ff1_wT": u(k_f1, (L, d_model, ffn_dim), s_attn).astype(jnp.bfloat16),
        "ff1_b": jnp.zeros((L, 1, ffn_dim), jnp.float32),
        "ff2_wT": u(k_f2, (L, ffn_dim, d_model), s_ffn).astype(jnp.bfloat16),
        "ff2_b": jnp.zeros((L, 1, d_model), jnp.float32),
    }


def fold_attention_scale(params, nhead):
    """One-time (inference-only) preprocessing: fold the 1/sqrt(head_dim)
    attention scale into the Q columns of the QKV projection weights/bias so
    the kernel skips the per-token VALU multiply."""
    D = params["in_wT"].shape[1]
    hd = D // nhead
    scale = 1.0 / math.sqrt(hd)
    col_scale = jnp.concatenate([jnp.full((D,), scale, jnp.float32),
                                 jnp.ones((2 * D,), jnp.float32)])
    out = dict(params)
    out["in_wT"] = (params["in_wT"].astype(jnp.float32)
                    * col_scale).astype(params["in_wT"].dtype)
    out["in_b"] = params["in_b"] * col_scale
    return out


# ----------------------------------------------------------------------------
# Forward pass (expects fold_attention_scale()-prepared params)
# ----------------------------------------------------------------------------
def char_transformer_forward(src, params, nhead, batch_tile=None):
    """src: int32 [seq_len, batch]  ->  logits [seq_len, batch, ntokens]."""
    S, B = src.shape
    D = params["embedding"].shape[1]
    assert S <= params["pe"].shape[0], "sequence longer than positional encoding"

    # Embedding gather directly into [B, S, D], * sqrt(d_model) + positional
    # encoding.  (plain-JAX glue around the Pallas kernels)
    x = params["embedding"][src.T] * math.sqrt(D)          # [B, S, D]
    x = x + params["pe"][:S][None, :, :]

    x = encoder_stack(x, params, nhead, batch_tile)        # [B, S, D]

    # [S, B, V]; the [B,S,D]->[S,B,*] permute lives inside the BlockSpecs.
    return final_linear_bsd(x, params["lin_wT"], params["lin_b"])


# ----------------------------------------------------------------------------
# Pure-JAX f32 reference (unfolded params) to sanity-check the kernels
# ----------------------------------------------------------------------------
def reference_forward(src, params, nhead):
    S, B = src.shape
    D = params["embedding"].shape[1]
    f32 = jnp.float32
    x = params["embedding"][src] * math.sqrt(D) + params["pe"][:S][:, None, :]
    mask = jnp.where(jnp.triu(jnp.ones((S, S), bool), k=1), -jnp.inf, 0.0).astype(f32)
    x = jnp.transpose(x, (1, 0, 2))                        # [B, S, D]
    hd = D // nhead
    L = params["in_wT"].shape[0]
    for l in range(L):
        in_wT = params["in_wT"][l].astype(f32); in_b = params["in_b"][l]
        out_wT = params["out_wT"][l].astype(f32); out_b = params["out_b"][l]
        ff1_wT = params["ff1_wT"][l].astype(f32); ff1_b = params["ff1_b"][l]
        ff2_wT = params["ff2_wT"][l].astype(f32); ff2_b = params["ff2_b"][l]
        qkv = x @ in_wT + in_b
        q, k, v = qkv[..., :D], qkv[..., D:2 * D], qkv[..., 2 * D:]
        q = q.reshape(B, S, nhead, hd).transpose(0, 2, 1, 3)
        k = k.reshape(B, S, nhead, hd).transpose(0, 2, 1, 3)
        v = v.reshape(B, S, nhead, hd).transpose(0, 2, 1, 3)
        s = jnp.einsum("bhqd,bhkd->bhqk", q, k) / math.sqrt(hd) + mask
        p = jax.nn.softmax(s, axis=-1)
        ctx = jnp.einsum("bhqk,bhkd->bhqd", p, v).transpose(0, 2, 1, 3).reshape(B, S, D)
        attn = ctx @ out_wT + out_b
        x = _layer_norm(x + attn, params["ln1_g"][l], params["ln1_b"][l])
        h = jnp.maximum(x @ ff1_wT + ff1_b, 0.0)
        x = _layer_norm(x + h @ ff2_wT + ff2_b, params["ln2_g"][l], params["ln2_b"][l])
    x = jnp.transpose(x, (1, 0, 2))                        # [S, B, D]
    return x @ params["lin_wT"].astype(f32) + params["lin_b"]


# ----------------------------------------------------------------------------
if __name__ == "__main__":
    NTOKENS = 50
    D_MODEL = 32
    NHEAD = 2
    FFN_DIM = 64
    NLAYERS = 2
    SEQ = 8
    BATCH = 2

    key = jax.random.PRNGKey(0)
    k_param, k_src = jax.random.split(key)
    params = init_params(k_param, NTOKENS, D_MODEL, NHEAD, FFN_DIM, NLAYERS)
    kernel_params = fold_attention_scale(params, NHEAD)
    src = jax.random.randint(k_src, (SEQ, BATCH), 0, NTOKENS, dtype=jnp.int32)

    fwd = jax.jit(partial(char_transformer_forward, nhead=NHEAD))
    out = jax.block_until_ready(fwd(src, kernel_params))
    assert out.shape == (SEQ, BATCH, NTOKENS), out.shape

    ref = jax.block_until_ready(reference_forward(src, params, NHEAD))
    err = float(jnp.max(jnp.abs(out - ref)))
    # bf16 matmul inputs + approx-reciprocal softmax vs. f32 reference.
    assert jnp.allclose(out, ref, atol=5e-2, rtol=5e-2), f"max|diff|={err}"

    print("KERNEL_OK")
</pallas_src>

<mosaic_0001>
module attributes {stable_mosaic.version = 11 : i64} {
  func.func @final_linear_kernel(%arg0: i32, %arg1: i32, %arg2: memref<2x8x32xf32, #tpu.memory_space<vmem>>, %arg3: memref<32x128xbf16, #tpu.memory_space<vmem>>, %arg4: memref<1x128xf32, #tpu.memory_space<vmem>>, %arg5: memref<8x2x128xf32, #tpu.memory_space<vmem>>) attributes {dimension_semantics = [#tpu.dimension_semantics<parallel>, #tpu.dimension_semantics<parallel>], iteration_bounds = array<i64: 1, 1>, scalar_prefetch = 0 : i64, scratch_operands = 0 : i64, tpu.core_type = #tpu.core_type<tc>, window_params = [{transform_indices = @transform_0, window_bounds = array<i64: 2, 8, 32>}, {transform_indices = @transform_1, window_bounds = array<i64: 32, 128>}, {transform_indices = @transform_2, window_bounds = array<i64: 1, 128>}, {transform_indices = @transform_3, window_bounds = array<i64: 8, 2, 128>}]} {
    %c0 = arith.constant 0 : index
    %c0_0 = arith.constant 0 : index
    %c0_1 = arith.constant 0 : index
    %0 = vector.load %arg2[%c0, %c0_0, %c0_1] : memref<2x8x32xf32, #tpu.memory_space<vmem>>, vector<2x8x32xf32>
    %1 = tpu.transpose %0, [1, 0, 2] : vector<2x8x32xf32> -> vector<8x2x32xf32>
    %2 = vector.shape_cast %1 : vector<8x2x32xf32> to vector<16x32xf32>
    %3 = arith.truncf %2 : vector<16x32xf32> to vector<16x32xbf16>
    %c0_2 = arith.constant 0 : index
    %c0_3 = arith.constant 0 : index
    %4 = vector.load %arg3[%c0_2, %c0_3] : memref<32x128xbf16, #tpu.memory_space<vmem>>, vector<32x128xbf16>
    %cst = arith.constant dense<0.000000e+00> : vector<16x128xf32>
    %5 = tpu.matmul %3, %4, %cst {dimension_numbers = #tpu.dot_dimension_numbers<[1], [0], [0], [1], [0, 0, 1, 1], [], []>} : vector<16x32xbf16>, vector<32x128xbf16>, vector<16x128xf32> -> vector<16x128xf32>
    %c0_4 = arith.constant 0 : index
    %c0_5 = arith.constant 0 : index
    %6 = vector.load %arg4[%c0_4, %c0_5] : memref<1x128xf32, #tpu.memory_space<vmem>>, vector<1x128xf32>
    %7 = vector.broadcast %6 : vector<1x128xf32> to vector<16x128xf32>
    %8 = arith.addf %5, %7 : vector<16x128xf32>
    %9 = vector.shape_cast %8 : vector<16x128xf32> to vector<8x2x128xf32>
    %c0_6 = arith.constant 0 : index
    %c0_7 = arith.constant 0 : index
    %c0_8 = arith.constant 0 : index
    %10 = vector.load %arg5[%c0_6, %c0_7, %c0_8] : memref<8x2x128xf32, #tpu.memory_space<vmem>>, vector<8x2x128xf32>
    tpu.vector_store %arg5[%c0_6, %c0_7, %c0_8], %9 {strides = array<i32>} : memref<8x2x128xf32, #tpu.memory_space<vmem>>, vector<8x2x128xf32>,
    return
  }
  func.func @transform_0(%arg0: i32, %arg1: i32) -> (i32, i32, i32) {
    %c0_i32 = arith.constant 0 : i32
    %c0_i32_0 = arith.constant 0 : i32
    %c0_i32_1 = arith.constant 0 : i32
    return %c0_i32, %arg0, %c0_i32_0 : i32, i32, i32
  }
  func.func @transform_1(%arg0: i32, %arg1: i32) -> (i32, i32) {
    %c0_i32 = arith.constant 0 : i32
    %c0_i32_0 = arith.constant 0 : i32
    return %c0_i32, %arg1 : i32, i32
  }
  func.func @transform_2(%arg0: i32, %arg1: i32) -> (i32, i32) {
    %c0_i32 = arith.constant 0 : i32
    %c0_i32_0 = arith.constant 0 : i32
    return %c0_i32, %arg1 : i32, i32
  }
  func.func @transform_3(%arg0: i32, %arg1: i32) -> (i32, i32, i32) {
    %c0_i32 = arith.constant 0 : i32
    %c0_i32_0 = arith.constant 0 : i32
    return %arg0, %c0_i32, %arg1 : i32, i32, i32
  }
}

module attributes {stable_mosaic.version = 11 : i64} {
  func.func @fused_encoder_kernel(%arg0: i32, %arg1: i32, %arg2: memref<2x8x32xf32, #tpu.memory_space<vmem>>, %arg3: memref<1x32x96xbf16, #tpu.memory_space<vmem>>, %arg4: memref<1x1x96xf32, #tpu.memory_space<vmem>>, %arg5: memref<1x32x32xbf16, #tpu.memory_space<vmem>>, %arg6: memref<1x1x32xf32, #tpu.memory_space<vmem>>, %arg7: memref<1x1x32xf32, #tpu.memory_space<vmem>>, %arg8: memref<1x1x32xf32, #tpu.memory_space<vmem>>, %arg9: memref<1x1x32xf32, #tpu.memory_space<vmem>>, %arg10: memref<1x1x32xf32, #tpu.memory_space<vmem>>, %arg11: memref<1x32x64xbf16, #tpu.memory_space<vmem>>, %arg12: memref<1x1x64xf32, #tpu.memory_space<vmem>>, %arg13: memref<1x64x32xbf16, #tpu.memory_space<vmem>>, %arg14: memref<1x1x32xf32, #tpu.memory_space<vmem>>, %arg15: memref<2x8x32xf32, #tpu.memory_space<vmem>>) attributes {dimension_semantics = [#tpu.dimension_semantics<parallel>, #tpu.dimension_semantics<arbitrary>], iteration_bounds = array<i64: 1, 2>, scalar_prefetch = 0 : i64, scratch_operands = 0 : i64, tpu.core_type = #tpu.core_type<tc>, window_params = [{transform_indices = @transform_0, window_bounds = array<i64: 2, 8, 32>}, {transform_indices = @transform_1, window_bounds = array<i64: 1, 32, 96>}, {transform_indices = @transform_2, window_bounds = array<i64: 1, 1, 96>}, {transform_indices = @transform_3, window_bounds = array<i64: 1, 32, 32>}, {transform_indices = @transform_4, window_bounds = array<i64: 1, 1, 32>}, {transform_indices = @transform_5, window_bounds = array<i64: 1, 1, 32>}, {transform_indices = @transform_6, window_bounds = array<i64: 1, 1, 32>}, {transform_indices = @transform_7, window_bounds = array<i64: 1, 1, 32>}, {transform_indices = @transform_8, window_bounds = array<i64: 1, 1, 32>}, {transform_indices = @transform_9, window_bounds = array<i64: 1, 32, 64>}, {transform_indices = @transform_10, window_bounds = array<i64: 1, 1, 64>}, {transform_indices = @transform_11, window_bounds = array<i64: 1, 64, 32>}, {transform_indices = @transform_12, window_bounds = array<i64: 1, 1, 32>}, {transform_indices = @transform_13, window_bounds = array<i64: 2, 8, 32>}]} {
    %c0_i32 = arith.constant 0 : i32
    %0 = arith.cmpi eq, %arg1, %c0_i32 : i32
    %1 = arith.extui %0 : i1 to i32
    %c0_i32_0 = arith.constant 0 : i32
    %2 = arith.cmpi ne, %1, %c0_i32_0 : i32
    scf.if %2 {
      %c0_66 = arith.constant 0 : index
      %c0_67 = arith.constant 0 : index
      %c0_68 = arith.constant 0 : index
      %155 = vector.load %arg2[%c0_66, %c0_67, %c0_68] : memref<2x8x32xf32, #tpu.memory_space<vmem>>, vector<2x8x32xf32>
      %c0_69 = arith.constant 0 : index
      %c0_70 = arith.constant 0 : index
      %c0_71 = arith.constant 0 : index
      %156 = vector.load %arg15[%c0_69, %c0_70, %c0_71] : memref<2x8x32xf32, #tpu.memory_space<vmem>>, vector<2x8x32xf32>
      tpu.vector_store %arg15[%c0_69, %c0_70, %c0_71], %155 {strides = array<i32>} : memref<2x8x32xf32, #tpu.memory_space<vmem>>, vector<2x8x32xf32>,
    } else {
    }
    %c0 = arith.constant 0 : index
    %c0_1 = arith.constant 0 : index
    %c0_2 = arith.constant 0 : index
    %3 = vector.load %arg15[%c0, %c0_1, %c0_2] : memref<2x8x32xf32, #tpu.memory_space<vmem>>, vector<2x8x32xf32>
    %4 = vector.shape_cast %3 : vector<2x8x32xf32> to vector<16x32xf32>
    %5 = arith.truncf %4 : vector<16x32xf32> to vector<16x32xbf16>
    %c0_3 = arith.constant 0 : index
    %c0_4 = arith.constant 0 : index
    %c0_5 = arith.constant 0 : index
    %6 = vector.load %arg3[%c0_3, %c0_4, %c0_5] : memref<1x32x96xbf16, #tpu.memory_space<vmem>>, vector<1x32x96xbf16>
    %7 = vector.shape_cast %6 : vector<1x32x96xbf16> to vector<32x96xbf16>
    %cst = arith.constant dense<0.000000e+00> : vector<16x96xf32>
    %8 = tpu.matmul %5, %7, %cst {dimension_numbers = #tpu.dot_dimension_numbers<[1], [0], [0], [1], [0, 0, 1, 1], [], []>} : vector<16x32xbf16>, vector<32x96xbf16>, vector<16x96xf32> -> vector<16x96xf32>
    %c0_6 = arith.constant 0 : index
    %c0_7 = arith.constant 0 : index
    %c0_8 = arith.constant 0 : index
    %9 = vector.load %arg4[%c0_6, %c0_7, %c0_8] : memref<1x1x96xf32, #tpu.memory_space<vmem>>, vector<1x1x96xf32>
    %10 = vector.shape_cast %9 : vector<1x1x96xf32> to vector<1x96xf32>
    %11 = vector.broadcast %10 : vector<1x96xf32> to vector<16x96xf32>
    %12 = arith.addf %8, %11 : vector<16x96xf32>
    %13 = tpu.iota {dimensions = array<i32: 0>} : vector<8x8xi32>
    %14 = tpu.iota {dimensions = array<i32: 1>} : vector<8x8xi32>
    %15 = arith.cmpi sle, %14, %13 : vector<8x8xi32>
    %16 = vector.shape_cast %15 : vector<8x8xi1> to vector<1x8x8xi1>
    %17 = vector.extract_strided_slice %12 {offsets = [0, 0], sizes = [16, 16], strides = [1, 1]} : vector<16x96xf32> to vector<16x16xf32>
    %18 = vector.shape_cast %17 : vector<16x16xf32> to vector<2x8x16xf32>
    %19 = arith.truncf %18 : vector<2x8x16xf32> to vector<2x8x16xbf16>
    %20 = vector.extract_strided_slice %12 {offsets = [0, 32], sizes = [16, 16], strides = [1, 1]} : vector<16x96xf32> to vector<16x16xf32>
    %21 = vector.shape_cast %20 : vector<16x16xf32> to vector<2x8x16xf32>
    %22 = arith.truncf %21 : vector<2x8x16xf32> to vector<2x8x16xbf16>
    %23 = vector.extract_strided_slice %12 {offsets = [0, 64], sizes = [16, 16], strides = [1, 1]} : vector<16x96xf32> to vector<16x16xf32>
    %24 = vector.shape_cast %23 : vector<16x16xf32> to vector<2x8x16xf32>
    %25 = arith.truncf %24 : vector<2x8x16xf32> to vector<2x8x16xbf16>
    "tpu.trace_start"() <{level = 10 : i32, message = "bqd,bkd->bqk"}> : () -> ()
    %cst_9 = arith.constant dense<0.000000e+00> : vector<2x8x8xf32>
    %26 = tpu.matmul %19, %22, %cst_9 {dimension_numbers = #tpu.dot_dimension_numbers<[2], [2], [1], [1], [0, 0, 0, 1, 1, 1], [0], [0]>} : vector<2x8x16xbf16>, vector<2x8x16xbf16>, vector<2x8x8xf32> -> vector<2x8x8xf32>
    %cst_10 = arith.constant -1.000000e+30 : f32
    "tpu.trace_stop"() : () -> ()
    %27 = vector.shape_cast %16 : vector<1x8x8xi1> to vector<1x8x8xi1>
    %28 = vector.broadcast %27 : vector<1x8x8xi1> to vector<2x8x8xi1>
    %29 = vector.broadcast %cst_10 : f32 to vector<2x8x8xf32>
    %30 = arith.select %28, %26, %29 : vector<2x8x8xi1>, vector<2x8x8xf32>
    %cst_11 = arith.constant dense<0xFF800000> : vector<2x8xf32>
    %31 = vector.multi_reduction <maximumf>, %30, %cst_11 [2] : vector<2x8x8xf32> to vector<2x8xf32>
    %32 = vector.shape_cast %31 : vector<2x8xf32> to vector<2x8x1xf32>
    %33 = vector.broadcast %32 : vector<2x8x1xf32> to vector<2x8x8xf32>
    %34 = arith.subf %30, %33 : vector<2x8x8xf32>
    %35 = math.exp %34 : vector<2x8x8xf32>
    %cst_12 = arith.constant dense<0.000000e+00> : vector<2x8xf32>
    %36 = vector.multi_reduction <add>, %35, %cst_12 [2] : vector<2x8x8xf32> to vector<2x8xf32>
    %37 = vector.shape_cast %36 : vector<2x8xf32> to vector<2x8x1xf32>
    %38 = tpu.reciprocal %37 {approx = true} : vector<2x8x1xf32> -> vector<2x8x1xf32>
    %39 = vector.broadcast %38 : vector<2x8x1xf32> to vector<2x8x8xf32>
    %40 = arith.mulf %35, %39 : vector<2x8x8xf32>
    %41 = arith.truncf %40 : vector<2x8x8xf32> to vector<2x8x8xbf16>
    "tpu.trace_start"() <{level = 10 : i32, message = "bqk,bkd->bqd"}> : () -> ()
    %cst_13 = arith.constant dense<0.000000e+00> : vector<2x8x16xf32>
    %42 = tpu.matmul %41, %25, %cst_13 {dimension_numbers = #tpu.dot_dimension_numbers<[2], [1], [1], [2], [0, 0, 0, 1, 1, 2], [0], [0]>} : vector<2x8x8xbf16>, vector<2x8x16xbf16>, vector<2x8x16xf32> -> vector<2x8x16xf32>
    "tpu.trace_stop"() : () -> ()
    %43 = vector.shape_cast %42 : vector<2x8x16xf32> to vector<16x16xf32>
    %44 = arith.truncf %43 : vector<16x16xf32> to vector<16x16xbf16>
    %45 = vector.extract_strided_slice %12 {offsets = [0, 16], sizes = [16, 16], strides = [1, 1]} : vector<16x96xf32> to vector<16x16xf32>
    %46 = vector.shape_cast %45 : vector<16x16xf32> to vector<2x8x16xf32>
    %47 = arith.truncf %46 : vector<2x8x16xf32> to vector<2x8x16xbf16>
    %48 = vector.extract_strided_slice %12 {offsets = [0, 48], sizes = [16, 16], strides = [1, 1]} : vector<16x96xf32> to vector<16x16xf32>
    %49 = vector.shape_cast %48 : vector<16x16xf32> to vector<2x8x16xf32>
    %50 = arith.truncf %49 : vector<2x8x16xf32> to vector<2x8x16xbf16>
    %51 = vector.extract_strided_slice %12 {offsets = [0, 80], sizes = [16, 16], strides = [1, 1]} : vector<16x96xf32> to vector<16x16xf32>
    %52 = vector.shape_cast %51 : vector<16x16xf32> to vector<2x8x16xf32>
    %53 = arith.truncf %52 : vector<2x8x16xf32> to vector<2x8x16xbf16>
    "tpu.trace_start"() <{level = 10 : i32, message = "bqd,bkd->bqk"}> : () -> ()
    %cst_14 = arith.constant dense<0.000000e+00> : vector<2x8x8xf32>
    %54 = tpu.matmul %47, %50, %cst_14 {dimension_numbers = #tpu.dot_dimension_numbers<[2], [2], [1], [1], [0, 0, 0, 1, 1, 1], [0], [0]>} : vector<2x8x16xbf16>, vector<2x8x16xbf16>, vector<2x8x8xf32> -> vector<2x8x8xf32>
    %cst_15 = arith.constant -1.000000e+30 : f32
    "tpu.trace_stop"() : () -> ()
    %55 = vector.shape_cast %16 : vector<1x8x8xi1> to vector<1x8x8xi1>
    %56 = vector.broadcast %55 : vector<1x8x8xi1> to vector<2x8x8xi1>
    %57 = vector.broadcast %cst_15 : f32 to vector<2x8x8xf32>
    %58 = arith.select %56, %54, %57 : vector<2x8x8xi1>, vector<2x8x8xf32>
    %cst_16 = arith.constant dense<0xFF800000> : vector<2x8xf32>
    %59 = vector.multi_reduction <maximumf>, %58, %cst_16 [2] : vector<2x8x8xf32> to vector<2x8xf32>
    %60 = vector.shape_cast %59 : vector<2x8xf32> to vector<2x8x1xf32>
    %61 = vector.broadcast %60 : vector<2x8x1xf32> to vector<2x8x8xf32>
    %62 = arith.subf %58, %61 : vector<2x8x8xf32>
    %63 = math.exp %62 : vector<2x8x8xf32>
    %cst_17 = arith.constant dense<0.000000e+00> : vector<2x8xf32>
    %64 = vector.multi_reduction <add>, %63, %cst_17 [2] : vector<2x8x8xf32> to vector<2x8xf32>
    %65 = vector.shape_cast %64 : vector<2x8xf32> to vector<2x8x1xf32>
    %66 = tpu.reciprocal %65 {approx = true} : vector<2x8x1xf32> -> vector<2x8x1xf32>
    %67 = vector.broadcast %66 : vector<2x8x1xf32> to vector<2x8x8xf32>
    %68 = arith.mulf %63, %67 : vector<2x8x8xf32>
    %69 = arith.truncf %68 : vector<2x8x8xf32> to vector<2x8x8xbf16>
    "tpu.trace_start"() <{level = 10 : i32, message = "bqk,bkd->bqd"}> : () -> ()
    %cst_18 = arith.constant dense<0.000000e+00> : vector<2x8x16xf32>
    %70 = tpu.matmul %69, %53, %cst_18 {dimension_numbers = #tpu.dot_dimension_numbers<[2], [1], [1], [2], [0, 0, 0, 1, 1, 2], [0], [0]>} : vector<2x8x8xbf16>, vector<2x8x16xbf16>, vector<2x8x16xf32> -> vector<2x8x16xf32>
    "tpu.trace_stop"() : () -> ()
    %71 = vector.shape_cast %70 : vector<2x8x16xf32> to vector<16x16xf32>
    %72 = arith.truncf %71 : vector<16x16xf32> to vector<16x16xbf16>
    %73 = tpu.concatenate %44, %72 in 1 : vector<16x16xbf16>, vector<16x16xbf16> -> vector<16x32xbf16>
    %c0_19 = arith.constant 0 : index
    %c0_20 = arith.constant 0 : index
    %c0_21 = arith.constant 0 : index
    %74 = vector.load %arg5[%c0_19, %c0_20, %c0_21] : memref<1x32x32xbf16, #tpu.memory_space<vmem>>, vector<1x32x32xbf16>
    %75 = vector.shape_cast %74 : vector<1x32x32xbf16> to vector<32x32xbf16>
    %cst_22 = arith.constant dense<0.000000e+00> : vector<16x32xf32>
    %76 = tpu.matmul %73, %75, %cst_22 {dimension_numbers = #tpu.dot_dimension_numbers<[1], [0], [0], [1], [0, 0, 1, 1], [], []>} : vector<16x32xbf16>, vector<32x32xbf16>, vector<16x32xf32> -> vector<16x32xf32>
    %c0_23 = arith.constant 0 : index
    %c0_24 = arith.constant 0 : index
    %c0_25 = arith.constant 0 : index
    %77 = vector.load %arg6[%c0_23, %c0_24, %c0_25] : memref<1x1x32xf32, #tpu.memory_space<vmem>>, vector<1x1x32xf32>
    %78 = vector.shape_cast %77 : vector<1x1x32xf32> to vector<1x32xf32>
    %79 = vector.broadcast %78 : vector<1x32xf32> to vector<16x32xf32>
    %80 = arith.addf %76, %79 : vector<16x32xf32>
    %81 = arith.addf %4, %80 : vector<16x32xf32>
    %c0_26 = arith.constant 0 : index
    %c0_27 = arith.constant 0 : index
    %c0_28 = arith.constant 0 : index
    %82 = vector.load %arg7[%c0_26, %c0_27, %c0_28] : memref<1x1x32xf32, #tpu.memory_space<vmem>>, vector<1x1x32xf32>
    %83 = vector.shape_cast %82 : vector<1x1x32xf32> to vector<1x32xf32>
    %c0_29 = arith.constant 0 : index
    %c0_30 = arith.constant 0 : index
    %c0_31 = arith.constant 0 : index
    %84 = vector.load %arg8[%c0_29, %c0_30, %c0_31] : memref<1x1x32xf32, #tpu.memory_space<vmem>>, vector<1x1x32xf32>
    %85 = vector.shape_cast %84 : vector<1x1x32xf32> to vector<1x32xf32>
    %cst_32 = arith.constant dense<0.000000e+00> : vector<16xf32>
    %86 = vector.multi_reduction <add>, %81, %cst_32 [1] : vector<16x32xf32> to vector<16xf32>
    %87 = vector.shape_cast %86 : vector<16xf32> to vector<16x1xf32>
    %cst_33 = arith.constant 3.200000e+01 : f32
    %88 = vector.broadcast %cst_33 : f32 to vector<16x1xf32>
    %89 = arith.divf %87, %88 : vector<16x1xf32>
    %90 = vector.broadcast %89 : vector<16x1xf32> to vector<16x32xf32>
    %91 = arith.subf %81, %90 : vector<16x32xf32>
    %92 = arith.mulf %91, %91 : vector<16x32xf32>
    %cst_34 = arith.constant dense<0.000000e+00> : vector<16xf32>
    %93 = vector.multi_reduction <add>, %92, %cst_34 [1] : vector<16x32xf32> to vector<16xf32>
    %94 = vector.shape_cast %93 : vector<16xf32> to vector<16x1xf32>
    %cst_35 = arith.constant 3.200000e+01 : f32
    %95 = vector.broadcast %cst_35 : f32 to vector<16x1xf32>
    %96 = arith.divf %94, %95 : vector<16x1xf32>
    %97 = vector.broadcast %89 : vector<16x1xf32> to vector<16x32xf32>
    %98 = arith.subf %81, %97 : vector<16x32xf32>
    %cst_36 = arith.constant 9.99999974E-6 : f32
    %99 = vector.broadcast %cst_36 : f32 to vector<16x1xf32>
    %100 = arith.addf %96, %99 : vector<16x1xf32>
    %101 = math.rsqrt %100 : vector<16x1xf32>
    %102 = vector.broadcast %101 : vector<16x1xf32> to vector<16x32xf32>
    %103 = arith.mulf %98, %102 : vector<16x32xf32>
    %104 = vector.broadcast %83 : vector<1x32xf32> to vector<16x32xf32>
    %105 = arith.mulf %103, %104 : vector<16x32xf32>
    %106 = vector.broadcast %85 : vector<1x32xf32> to vector<16x32xf32>
    %107 = arith.addf %105, %106 : vector<16x32xf32>
    %108 = arith.truncf %107 : vector<16x32xf32> to vector<16x32xbf16>
    %c0_37 = arith.constant 0 : index
    %c0_38 = arith.constant 0 : index
    %c0_39 = arith.constant 0 : index
    %109 = vector.load %arg11[%c0_37, %c0_38, %c0_39] : memref<1x32x64xbf16, #tpu.memory_space<vmem>>, vector<1x32x64xbf16>
    %110 = vector.shape_cast %109 : vector<1x32x64xbf16> to vector<32x64xbf16>
    %cst_40 = arith.constant dense<0.000000e+00> : vector<16x64xf32>
    %111 = tpu.matmul %108, %110, %cst_40 {dimension_numbers = #tpu.dot_dimension_numbers<[1], [0], [0], [1], [0, 0, 1, 1], [], []>} : vector<16x32xbf16>, vector<32x64xbf16>, vector<16x64xf32> -> vector<16x64xf32>
    %c0_41 = arith.constant 0 : index
    %c0_42 = arith.constant 0 : index
    %c0_43 = arith.constant 0 : index
    %112 = vector.load %arg12[%c0_41, %c0_42, %c0_43] : memref<1x1x64xf32, #tpu.memory_space<vmem>>, vector<1x1x64xf32>
    %113 = vector.shape_cast %112 : vector<1x1x64xf32> to vector<1x64xf32>
    %114 = vector.broadcast %113 : vector<1x64xf32> to vector<16x64xf32>
    %115 = arith.addf %111, %114 : vector<16x64xf32>
    %cst_44 = arith.constant 0.000000e+00 : f32
    %116 = vector.broadcast %cst_44 : f32 to vector<16x64xf32>
    %117 = arith.maximumf %115, %116 : vector<16x64xf32>
    %118 = arith.truncf %117 : vector<16x64xf32> to vector<16x64xbf16>
    %c0_45 = arith.constant 0 : index
    %c0_46 = arith.constant 0 : index
    %c0_47 = arith.constant 0 : index
    %119 = vector.load %arg13[%c0_45, %c0_46, %c0_47] : memref<1x64x32xbf16, #tpu.memory_space<vmem>>, vector<1x64x32xbf16>
    %120 = vector.shape_cast %119 : vector<1x64x32xbf16> to vector<64x32xbf16>
    %cst_48 = arith.constant dense<0.000000e+00> : vector<16x32xf32>
    %121 = tpu.matmul %118, %120, %cst_48 {dimension_numbers = #tpu.dot_dimension_numbers<[1], [0], [0], [1], [0, 0, 1, 1], [], []>} : vector<16x64xbf16>, vector<64x32xbf16>, vector<16x32xf32> -> vector<16x32xf32>
    %c0_49 = arith.constant 0 : index
    %c0_50 = arith.constant 0 : index
    %c0_51 = arith.constant 0 : index
    %122 = vector.load %arg14[%c0_49, %c0_50, %c0_51] : memref<1x1x32xf32, #tpu.memory_space<vmem>>, vector<1x1x32xf32>
    %123 = vector.shape_cast %122 : vector<1x1x32xf32> to vector<1x32xf32>
    %124 = vector.broadcast %123 : vector<1x32xf32> to vector<16x32xf32>
    %125 = arith.addf %121, %124 : vector<16x32xf32>
    %126 = arith.addf %107, %125 : vector<16x32xf32>
    %c0_52 = arith.constant 0 : index
    %c0_53 = arith.constant 0 : index
    %c0_54 = arith.constant 0 : index
    %127 = vector.load %arg9[%c0_52, %c0_53, %c0_54] : memref<1x1x32xf32, #tpu.memory_space<vmem>>, vector<1x1x32xf32>
    %128 = vector.shape_cast %127 : vector<1x1x32xf32> to vector<1x32xf32>
    %c0_55 = arith.constant 0 : index
    %c0_56 = arith.constant 0 : index
    %c0_57 = arith.constant 0 : index
    %129 = vector.load %arg10[%c0_55, %c0_56, %c0_57] : memref<1x1x32xf32, #tpu.memory_space<vmem>>, vector<1x1x32xf32>
    %130 = vector.shape_cast %129 : vector<1x1x32xf32> to vector<1x32xf32>
    %cst_58 = arith.constant dense<0.000000e+00> : vector<16xf32>
    %131 = vector.multi_reduction <add>, %126, %cst_58 [1] : vector<16x32xf32> to vector<16xf32>
    %132 = vector.shape_cast %131 : vector<16xf32> to vector<16x1xf32>
    %cst_59 = arith.constant 3.200000e+01 : f32
    %133 = vector.broadcast %cst_59 : f32 to vector<16x1xf32>
    %134 = arith.divf %132, %133 : vector<16x1xf32>
    %135 = vector.broadcast %134 : vector<16x1xf32> to vector<16x32xf32>
    %136 = arith.subf %126, %135 : vector<16x32xf32>
    %137 = arith.mulf %136, %136 : vector<16x32xf32>
    %cst_60 = arith.constant dense<0.000000e+00> : vector<16xf32>
    %138 = vector.multi_reduction <add>, %137, %cst_60 [1] : vector<16x32xf32> to vector<16xf32>
    %139 = vector.shape_cast %138 : vector<16xf32> to vector<16x1xf32>
    %cst_61 = arith.constant 3.200000e+01 : f32
    %140 = vector.broadcast %cst_61 : f32 to vector<16x1xf32>
    %141 = arith.divf %139, %140 : vector<16x1xf32>
    %142 = vector.broadcast %134 : vector<16x1xf32> to vector<16x32xf32>
    %143 = arith.subf %126, %142 : vector<16x32xf32>
    %cst_62 = arith.constant 9.99999974E-6 : f32
    %144 = vector.broadcast %cst_62 : f32 to vector<16x1xf32>
    %145 = arith.addf %141, %144 : vector<16x1xf32>
    %146 = math.rsqrt %145 : vector<16x1xf32>
    %147 = vector.broadcast %146 : vector<16x1xf32> to vector<16x32xf32>
    %148 = arith.mulf %143, %147 : vector<16x32xf32>
    %149 = vector.broadcast %128 : vector<1x32xf32> to vector<16x32xf32>
    %150 = arith.mulf %148, %149 : vector<16x32xf32>
    %151 = vector.broadcast %130 : vector<1x32xf32> to vector<16x32xf32>
    %152 = arith.addf %150, %151 : vector<16x32xf32>
    %153 = vector.shape_cast %152 : vector<16x32xf32> to vector<2x8x32xf32>
    %c0_63 = arith.constant 0 : index
    %c0_64 = arith.constant 0 : index
    %c0_65 = arith.constant 0 : index
    %154 = vector.load %arg15[%c0_63, %c0_64, %c0_65] : memref<2x8x32xf32, #tpu.memory_space<vmem>>, vector<2x8x32xf32>
    tpu.vector_store %arg15[%c0_63, %c0_64, %c0_65], %153 {strides = array<i32>} : memref<2x8x32xf32, #tpu.memory_space<vmem>>, vector<2x8x32xf32>,
    return
  }
  func.func @transform_0(%arg0: i32, %arg1: i32) -> (i32, i32, i32) {
    %c0_i32 = arith.constant 0 : i32
    %c0_i32_0 = arith.constant 0 : i32
    %c0_i32_1 = arith.constant 0 : i32
    return %arg0, %c0_i32, %c0_i32_0 : i32, i32, i32
  }
  func.func @transform_1(%arg0: i32, %arg1: i32) -> (i32, i32, i32) {
    %c0_i32 = arith.constant 0 : i32
    %c0_i32_0 = arith.constant 0 : i32
    %c0_i32_1 = arith.constant 0 : i32
    return %arg1, %c0_i32, %c0_i32_0 : i32, i32, i32
  }
  func.func @transform_2(%arg0: i32, %arg1: i32) -> (i32, i32, i32) {
    %c0_i32 = arith.constant 0 : i32
    %c0_i32_0 = arith.constant 0 : i32
    %c0_i32_1 = arith.constant 0 : i32
    return %arg1, %c0_i32, %c0_i32_0 : i32, i32, i32
  }
  func.func @transform_3(%arg0: i32, %arg1: i32) -> (i32, i32, i32) {
    %c0_i32 = arith.constant 0 : i32
    %c0_i32_0 = arith.constant 0 : i32
    %c0_i32_1 = arith.constant 0 : i32
    return %arg1, %c0_i32, %c0_i32_0 : i32, i32, i32
  }
  func.func @transform_4(%arg0: i32, %arg1: i32) -> (i32, i32, i32) {
    %c0_i32 = arith.constant 0 : i32
    %c0_i32_0 = arith.constant 0 : i32
    %c0_i32_1 = arith.constant 0 : i32
    return %arg1, %c0_i32, %c0_i32_0 : i32, i32, i32
  }
  func.func @transform_5(%arg0: i32, %arg1: i32) -> (i32, i32, i32) {
    %c0_i32 = arith.constant 0 : i32
    %c0_i32_0 = arith.constant 0 : i32
    %c0_i32_1 = arith.constant 0 : i32
    return %arg1, %c0_i32, %c0_i32_0 : i32, i32, i32
  }
  func.func @transform_6(%arg0: i32, %arg1: i32) -> (i32, i32, i32) {
    %c0_i32 = arith.constant 0 : i32
    %c0_i32_0 = arith.constant 0 : i32
    %c0_i32_1 = arith.constant 0 : i32
    return %arg1, %c0_i32, %c0_i32_0 : i32, i32, i32
  }
  func.func @transform_7(%arg0: i32, %arg1: i32) -> (i32, i32, i32) {
    %c0_i32 = arith.constant 0 : i32
    %c0_i32_0 = arith.constant 0 : i32
    %c0_i32_1 = arith.constant 0 : i32
    return %arg1, %c0_i32, %c0_i32_0 : i32, i32, i32
  }
  func.func @transform_8(%arg0: i32, %arg1: i32) -> (i32, i32, i32) {
    %c0_i32 = arith.constant 0 : i32
    %c0_i32_0 = arith.constant 0 : i32
    %c0_i32_1 = arith.constant 0 : i32
    return %arg1, %c0_i32, %c0_i32_0 : i32, i32, i32
  }
  func.func @transform_9(%arg0: i32, %arg1: i32) -> (i32, i32, i32) {
    %c0_i32 = arith.constant 0 : i32
    %c0_i32_0 = arith.constant 0 : i32
    %c0_i32_1 = arith.constant 0 : i32
    return %arg1, %c0_i32, %c0_i32_0 : i32, i32, i32
  }
  func.func @transform_10(%arg0: i32, %arg1: i32) -> (i32, i32, i32) {
    %c0_i32 = arith.constant 0 : i32
    %c0_i32_0 = arith.constant 0 : i32
    %c0_i32_1 = arith.constant 0 : i32
    return %arg1, %c0_i32, %c0_i32_0 : i32, i32, i32
  }
  func.func @transform_11(%arg0: i32, %arg1: i32) -> (i32, i32, i32) {
    %c0_i32 = arith.constant 0 : i32
    %c0_i32_0 = arith.constant 0 : i32
    %c0_i32_1 = arith.constant 0 : i32
    return %arg1, %c0_i32, %c0_i32_0 : i32, i32, i32
  }
  func.func @transform_12(%arg0: i32, %arg1: i32) -> (i32, i32, i32) {
    %c0_i32 = arith.constant 0 : i32
    %c0_i32_0 = arith.constant 0 : i32
    %c0_i32_1 = arith.constant 0 : i32
    return %arg1, %c0_i32, %c0_i32_0 : i32, i32, i32
  }
  func.func @transform_13(%arg0: i32, %arg1: i32) -> (i32, i32, i32) {
    %c0_i32 = arith.constant 0 : i32
    %c0_i32_0 = arith.constant 0 : i32
    %c0_i32_1 = arith.constant 0 : i32
    return %arg0, %c0_i32, %c0_i32_0 : i32, i32, i32
  }
}

</mosaic_0001>

<bundles_post_ra>
// kernel: char_transformer_forward.3
= control target key start
LH: loop header
LB: loop body
LE: loop exit
PB: predicated region body
PF: predicated region fallthrough
CT: control target
= control target key end

     0   :  { %v22_v1 = vlaneseq  ;;  %v315_v2 = vmov 0.0   ;;  %vm316_vm0 = vmmov 0   ;;  %v317_v6 = vmov 1983009808   ;;  %s360_s0 = inlined_call_operand.vmem [shape: f32[2,8,32], index: 0, kind: input, shape index: {}]   ;;  %s361_s1 = inlined_call_operand.vmem [shape: bf16[32,128], index: 1, kind: input, shape index: {}]   ;;  %s362_s2 = inlined_call_operand.vmem [shape: f32[1,128], index: 2, kind: input, shape index: {}]   ;;  %s363_s3 = inlined_call_operand.hbm [shape: f32[8,2,128], index: 3, kind: output, shape index: {}]  }
   0x1   :  { %v291_v0 = vld [vmem:[%s361_s1 + $0x8] sm:$0xff]   ;;  %276 = vmatprep.subr.bf16.mxu0 %v315_v2  ;;  %v292_v3 = vld [vmem:[%s361_s1] sm:$0xff]   ;;  %280 = vmatprep.mubr.msk.bf16.mxu0 %vm316_vm0, %v315_v2  ;;  %v20_v7 = vunpack.c.l.s4 %v317_v6 }
   0x2   :  { %277 = vmatpush3.bf16.msra.mxu0 %v291_v0  ;;  %v16_v4 = vld [vmem:[%s360_s0] sm:$0xff]  ;;  %v17_v5 = vld [vmem:[%s360_s0 + $0x8] sm:$0xff]  ;;  %v23_v8 = vshrl.u32 %v22_v1, 7 }
   0x3   :  { %278 = vmatprep.subr.bf16.mxu0 %v315_v2 }
   0x4   :  { %8 = vsyncpa [#allocation3], 0  ;;  %v318_v9 = vmov 1934713408   ;;  %v18_v11 = vcombine.high %v16_v4, %v315_v2  ;;  %v21_v12 = vunpack.c.0.s8 %v20_v7  ;;  %v33_v13 = vcombine.high %v17_v5, %v315_v2  ;;  %v265_v44 = vld [vmem:[%s362_s2] ss:$0 sm:$0xff] }
   0x5   :  { %v51_v10 = vunpack.c.l.s4 %v318_v9  ;;  %vm152_vm1 = vcmask 261120   ;;  %s319_s20 = smov [#allocation2]  }
   0x6   :  { %279 = vmatpush3.bf16.msra.mxu0 %v292_v3  ;;  %v24_v15 = vsub.s32 %v21_v12, %v23_v8  ;;  %s254_s21 = sshll.u32 %s319_s20, 4  ;;  %s255_s21 = int_to_ptr.vmem [resolvable:$true] %s254_s21 }
   0x7   :  { %v52_v14 = vunpack.c.0.s8 %v51_v10  ;;  %s293_s2 = scalar_lea.vmem %s255_s21, 256  ;;  %p298_p1 = scmp.lt.s32.totalorder %s255_s21, %s255_s21 }
   0x8   :  { %v25_v17 = vrot.slane %v16_v4, %v24_v15  ;;  %v32_v18 = vrot.slane %v18_v11, %v24_v15  ;;  %v40_v19 = vrot.slane %v17_v5, %v24_v15  ;;  %v47_v20 = vrot.slane %v33_v13, %v24_v15  ;;  %p294_p0 = scmp.ne.s32.totalorder %s255_s21, %s293_s2  ;;  %p299_p2 = scmp.lt.s32.totalorder %s293_s2, %s293_s2 }
   0x9   :  { %v55_v16 = vsub.s32 %v52_v14, %v23_v8 }
   0xa   :  { %v48_v21 = vcombine.low %v25_v17, %v40_v19  ;;  %v49_v22 = vcombine.high %v25_v17, %v40_v19  ;;  %v64_v23 = vcombine.low %v32_v18, %v47_v20  ;;  %v65_v24 = vcombine.high %v32_v18, %v47_v20  ;;  %p300_p3 = por %p299_p2, %p298_p1 }
   0xc   :  { %v56_v25 = vrot.slane %v48_v21, %v55_v16  ;;  %v63_v26 = vrot.slane %v49_v22, %v55_v16  ;;  %v72_v27 = vrot.slane %v64_v23, %v55_v16  ;;  %v79_v28 = vrot.slane %v65_v24, %v55_v16  ;;  %p301_p4 = pnand %p300_p3, %p294_p0 }
   0xe   :  { %v80_v29 = vcombine.high %v56_v25, %v315_v2  ;;  %v81_v30 = vcombine.high %v63_v26, %v315_v2  ;;  %v82_v31 = vcombine.high %v72_v27, %v315_v2  ;;  %v83_v32 = vcombine.high %v79_v28, %v315_v2 }
  0x10   :  { %v92_v33 = vcombine.low %v56_v25, %v80_v29  ;;  %v93_v34 = vcombine.low %v63_v26, %v81_v30  ;;  %v109_v35 = vcombine.low %v72_v27, %v82_v31  ;;  %v110_v36 = vcombine.low %v79_v28, %v83_v32 }
  0x12   :  { %v100_v37 = vrot.slane %v92_v33, %v24_v15  ;;  %v107_v38 = vrot.slane %v93_v34, %v24_v15  ;;  %v117_v39 = vrot.slane %v109_v35, %v24_v15  ;;  %v124_v40 = vrot.slane %v110_v36, %v24_v15 }
  0x14   :  { %v108_v41 = vcombine.low %v100_v37, %v107_v38  ;;  %v125_v42 = vcombine.low %v117_v39, %v124_v40 }
  0x16   :  { %v128_v43 = vpack.c.bf16 %v125_v42, %v108_v41 }
  0x18   :  { %281 = vmatmul.mubr.msk.bf16.vlgmr.msra.gmra.mxu0 %vm152_vm1, %v128_v43 }
  0xd8   :  { %v190_v45 = vpop.f32.mrf.mxu0 }
  0xd9   :  { %v191_v46 = vadd.f32 %v265_v44, %v190_v45 }
  0xda   :  { %v282_v47 = vpop.f32.mrf.mxu0 }
  0xdb   :  { %v199_v48 = vcombine.high %v191_v46, %v191_v46  ;;  %v206_v49 = vrot.slane %v191_v46, %v24_v15  ;;  %269 = vst.sshfl [vmem:[#allocation2] sm:$0x3 pattern:$0x76325410] %v191_v46 }
  0xdc   :  { %v193_v50 = vpop.f32.mrf.mxu0 }
  0xdd   :  { %v213_v51 = vrot.slane %v199_v48, %v24_v15  ;;  %v214_v52 = vcombine.high %v206_v49, %v206_v49  ;;  %270 = vst.sshfl [vmem:[#allocation2 + $0x4] sm:$0x3 pattern:$0x76325410] %v199_v48  ;;  %v194_v53 = vadd.f32 %v265_v44, %v193_v50 }
  0xde   :  { %v283_v54 = vpop.f32.mrf.mxu0 }
  0xdf   :  { %v215_v55 = vcombine.high %v213_v51, %v213_v51  ;;  %242 = vst [vmem:[#allocation2 + $0x2] sm:$0x3] %v214_v52  ;;  %v216_v56 = vcombine.high %v194_v53, %v194_v53  ;;  %v223_v57 = vrot.slane %v194_v53, %v24_v15  ;;  %271 = vst.sshfl [vmem:[#allocation2 + $0x8] sm:$0x3 pattern:$0x76325410] %v194_v53 }
  0xe1   :  { %244 = vst [vmem:[#allocation2 + $0x6] sm:$0x3] %v215_v55  ;;  %v230_v58 = vrot.slane %v216_v56, %v24_v15  ;;  %v231_v59 = vcombine.high %v223_v57, %v223_v57  ;;  %272 = vst.sshfl [vmem:[#allocation2 + $0xc] sm:$0x3 pattern:$0x76325410] %v216_v56 }
  0xe3   :  { %v232_v60 = vcombine.high %v230_v58, %v230_v58  ;;  %246 = vst [vmem:[#allocation2 + $0xa] sm:$0x3] %v231_v59 }
  0xe5   :  { %248 = vst [vmem:[#allocation2 + $0xe] sm:$0x3] %v232_v60 }
  0xe6   :  { %304 = shalt.err (!%p301_p4)
}
  0xe7   :  { %s320_s22 = smov 32   ;;  %s321_s23 = smov 2  }
  0xe8   :  { %260 = dma.vmem_to_hbm [thread:$0]  %s255_s21, 256, %s363_s3, [#allocation3], %s320_s22, %s320_s22, %s321_s23  }
  0xe9   :  { %313 = dma.done.wait [#allocation3], 256  }
  0xea   :  { %314 = vsyncadd [#allocation3], 4294967040 }
  0xeb   :  { %264 = vsyncpa [#allocation3], 1 }

// kernel: char_transformer_forward.2
= control target key start
LH: loop header
LB: loop body
LE: loop exit
PB: predicated region body
PF: predicated region fallthrough
CT: control target
= control target key end

     0   :  { %s3296_s0 = inlined_call_operand.vmem [shape: f32[2,8,32], index: 0, kind: input, shape index: {}]   ;;  %s3297_s1 = inlined_call_operand.hbm [shape: bf16[2,32,96], index: 1, kind: input, shape index: {}]   ;;  %s3298_s2 = inlined_call_operand.hbm [shape: f32[2,1,96], index: 2, kind: input, shape index: {}]   ;;  %s3299_s3 = inlined_call_operand.hbm [shape: bf16[2,32,32], index: 3, kind: input, shape index: {}]   ;;  %s3300_s4 = inlined_call_operand.hbm [shape: f32[2,1,32], index: 4, kind: input, shape index: {}]   ;;  %s3301_s5 = inlined_call_operand.hbm [shape: f32[2,1,32], index: 5, kind: input, shape index: {}]   ;;  %s3302_s6 = inlined_call_operand.hbm [shape: f32[2,1,32], index: 6, kind: input, shape index: {}]   ;;  %s3303_s7 = inlined_call_operand.hbm [shape: f32[2,1,32], index: 7, kind: input, shape index: {}]   ;;  %s3304_s8 = inlined_call_operand.hbm [shape: f32[2,1,32], index: 8, kind: input, shape index: {}]   ;;  %s3305_s9 = inlined_call_operand.hbm [shape: bf16[2,32,64], index: 9, kind: input, shape index: {}]   ;;  %s3306_s10 = inlined_call_operand.hbm [shape: f32[2,1,64], index: 10, kind: input, shape index: {}]   ;;  %s3307_s11 = inlined_call_operand.vmem [shape: bf16[2,64,32], index: 11, kind: input, shape index: {}]   ;;  %s3308_s12 = inlined_call_operand.hbm [shape: f32[2,1,32], index: 12, kind: input, shape index: {}]   ;;  %s3309_s13 = inlined_call_operand.vmem [shape: f32[2,8,32], index: 13, kind: output, shape index: {}]  }
   0x1   :  { %3324 = sst [smem:[#allocation31_spill]] %s3296_s0 }
   0x2   :  { %3325 = sst [smem:[#allocation32_spill]] %s3297_s1 }
   0x3   :  { %3326 = sst [smem:[#allocation33_spill]] %s3298_s2 }
   0x4   :  { %3327 = sst [smem:[#allocation34_spill]] %s3300_s4 }
   0x5   :  { %3328 = sst [smem:[#allocation35_spill]] %s3302_s6 }
   0x6   :  { %3329 = sst [smem:[#allocation36_spill]] %s3304_s8 }
   0x7   :  { %3330 = sst [smem:[#allocation37_spill]] %s3306_s10 }
   0x8   :  { %3331 = sst [smem:[#allocation38_spill]] %s3307_s11 }
   0x9   :  { %3332 = sst [smem:[#allocation39_spill]] %s3309_s13 }
   0xa   :  { %18 = vsyncpa [#allocation3], 0 }
   0xb   :  { %20 = vsyncpa [#allocation3 + $0x1], 0 }
   0xc   :  { %21 = vsyncpa [#allocation5], 0 }
   0xd   :  { %23 = vsyncpa [#allocation5 + $0x1], 0 }
   0xe   :  { %24 = vsyncpa [#allocation8], 0 }
   0xf   :  { %26 = vsyncpa [#allocation8 + $0x1], 0 }
  0x10   :  { %27 = vsyncpa [#allocation11], 0 }
  0x11   :  { %29 = vsyncpa [#allocation11 + $0x1], 0 }
  0x12   :  { %30 = vsyncpa [#allocation14], 0 }
  0x13   :  { %32 = vsyncpa [#allocation14 + $0x1], 0 }
  0x14   :  { %33 = vsyncpa [#allocation17], 0 }
  0x15   :  { %35 = vsyncpa [#allocation17 + $0x1], 0  ;;  %s2803_s25 = smov 0   ;;  %s2805_s26 = smov 0  }
  0x16   :  { %s2807_s27 = smov 0   ;;  %s2809_s28 = smov 0  }
  0x17   :  { %s2811_s29 = smov 0   ;;  %s2813_s30 = smov 0  }
  0x18 LB: > { %3333 = sst [smem:[#allocation25_spill]] %s2698_s27  ;;  %s3310_s14 = sadd.s32 4294967295, %s2710_s30   ;;  %s2710_s30 = sphi %s2813_s30, %s41_s30   ;;  %s2706_s29 = sphi %s2811_s29, %s3369_s29   ;;  %s2702_s28 = sphi %s2809_s28, %s3368_s28   ;;  %s2698_s27 = sphi %s2807_s27, %s3367_s27   ;;  %s2694_s26 = sphi %s2805_s26, %s3371_s26   ;;  %s2690_s25 = sphi %s2803_s25, %s3370_s25  }
  0x19   : > { %3334 = sst [smem:[#allocation26_spill]] %s2702_s28  ;;  %s50_s15 = sadd.s32 1, %s2706_s29 }
  0x1a   : > { %3335 = sst [smem:[#allocation27_spill]] %s2706_s29  ;;  %p51_p0 = scmp.ge.s32.totalorder %s50_s15, 2 }
  0x1b   : > { %3336 = sst [smem:[#allocation28_spill]] %s2710_s30  ;;  %s86_s16 = sadd.s32 1, %s2698_s27 }
  0x1c   : > { %p93_p1 = scmp.ne.s32.totalorder %s2698_s27, %s2694_s26  ;;  %p94_p2 = scmp.eq.s32.totalorder %s2710_s30, 0 }
  0x1d   : > { %s3373_s15 = smov (%p51_p0, %s50_s15), 0  ;;  %p99_p4 = scmp.ne.s32.totalorder %s2694_s26, %s2690_s25 }
  0x1e   : > { %3337 = sst [smem:[#allocation29_spill]] %s3373_s15  ;;  %p95_p3 = por %p94_p2, %p93_p1 }
  0x1f   : > { %s83_s17 = ssub.s32 %s2706_s29, %s3373_s15  ;;  %p100_p5 = scmp.eq.s32.totalorder %s3310_s14, 0 }
  0x20   : > { %p84_p6 = scmp.eq.s32.totalorder %s83_s17, 0  ;;  %p2239_p8 = scmp.lt.s32.totalorder %s2710_s30, 2 }
  0x21   : > { %p2844_p7 = por %p100_p5, %p99_p4  ;;  %s2853_s20 = sand.u32 1, %s2698_s27  }
  0x22   : > { %s2850_s19 = scalar_select %p84_p6, %s2698_s27, %s86_s16  }
  0x23   : > { %p2855_p9 = pnand %p2239_p8, %p95_p3  ;;  %s2860_s22 = sand.u32 1, %s2710_s30  }
  0x24   : > { %3339 = sst [smem:[#allocation30_spill]] %s2850_s19  ;;  %s2863_s23 = sshll.u32 %s2706_s29, 4 }
  0x25   : > { %s468_s24 = scalar_lea.vmem [#allocation4], %s2853_s20  ;;  %s3341_s2 = sld [smem:[#allocation33_spill]] }
  0x26   : > { %s475_s25 = sshll.u32 %s468_s24, 4  ;;  %s3316_s15 = scalar_lea.sflag [#allocation5], %s2860_s22  ;;  %s476_s25 = int_to_ptr.vmem [resolvable:$true] %s475_s25 }
  0x27   : > { %p2873_p10 = pneg %p2855_p9  ;;  %s2345_s27 = scalar_lea.vmem %s476_s25, 16 }
  0x28   : > { %p2346_p11 = scmp.ne.s32.totalorder %s476_s25, %s2345_s27  ;;  %s2712_s13 = smov [#allocation4]  }
  0x29   : > { %s2350_s0 = sshll.u32 %s2712_s13, 4  ;;  %s2351_s0 = int_to_ptr.vmem [resolvable:$false] %s2350_s0 }
  0x2a   : > { %p2348_p12 = pnand %p2346_p11, %p2873_p10  ;;  %s2352_s24 = scalar_lea.vmem %s2351_s0, 32 }
  0x2b   : > { %s473_s16 = scalar_lea.hbm %s3341_s2, %s2863_s23  ;;  %p2353_p0 = scmp.lt.s32.totalorder %s476_s25, %s2351_s0 }
  0x2c   : > { %p2349_p13 = pneg %p2348_p12  ;;  %p2354_p1 = scmp.lt.s32.totalorder %s2352_s24, %s2345_s27 }
  0x2e   : > { %p2355_p2 = por %p2354_p1, %p2353_p0 }
  0x30   : > { %p2356_p3 = pnand %p2355_p2, %p2349_p13 }
  0x32   : > { %2359 = shalt.err (!%p2356_p3)
}
  0x33   : > { %2211 = dma.hbm_to_vmem [thread:$0]  (!%p2855_p9), %s473_s16, 16, %s476_s25, %s3316_s15  }
  0x34   : > { %p2024_p4 = scmp.ge.s32.totalorder %s2710_s30, 1  ;;  %p649_p5 = scmp.lt.s32.totalorder %s2710_s30, 3 }
  0x35   : > { %s3344_s4 = sld [smem:[#allocation34_spill]]  ;;  %s506_s17 = scalar_lea.vmem [#allocation7], %s2853_s20 }
  0x36   : > { %p2885_p6 = pnand %p2024_p4, %p649_p5  ;;  %s513_s24 = sshll.u32 %s506_s17, 4  ;;  %s514_s24 = int_to_ptr.vmem [resolvable:$true] %s513_s24 }
  0x37   : > { %s3319_s2 = scalar_lea.sflag [#allocation8], %s2860_s22  ;;  %s2373_s11 = scalar_lea.vmem %s514_s24, 16 }
  0x38   : > { %p2374_p8 = scmp.ne.s32.totalorder %s514_s24, %s2373_s11  ;;  %s2713_s25 = smov [#allocation7]  }
  0x39   : > { %s2378_s16 = sshll.u32 %s2713_s25, 4  ;;  %s2379_s16 = int_to_ptr.vmem [resolvable:$false] %s2378_s16 }
  0x3a   : > { %p2376_p11 = pnand %p2374_p8, %p2873_p10  ;;  %s2380_s15 = scalar_lea.vmem %s2379_s16, 32 }
  0x3b   : > { %s511_s14 = scalar_lea.hbm %s3344_s4, %s2863_s23  ;;  %p2381_p13 = scmp.lt.s32.totalorder %s514_s24, %s2379_s16 }
  0x3c   : > { %p2377_p12 = pneg %p2376_p11  ;;  %p2382_p0 = scmp.lt.s32.totalorder %s2380_s15, %s2373_s11 }
  0x3e   : > { %p2383_p1 = por %p2382_p0, %p2381_p13 }
  0x40   : > { %p2384_p2 = pnand %p2383_p1, %p2377_p12 }
  0x42   : > { %2387 = shalt.err (!%p2384_p2)
}
  0x43   : > { %2217 = dma.hbm_to_vmem [thread:$0]  (!%p2855_p9), %s511_s14, 16, %s514_s24, %s3319_s2  }
  0x44   : > { %s3345_s6 = sld [smem:[#allocation35_spill]]  ;;  %s540_s25 = scalar_lea.vmem [#allocation10], %s2853_s20 }
  0x45   : > { %s547_s4 = sshll.u32 %s540_s25, 4  ;;  %s3320_s11 = scalar_lea.sflag [#allocation11], %s2860_s22  ;;  %s548_s4 = int_to_ptr.vmem [resolvable:$true] %s547_s4 }
  0x46   : > { %s2401_s15 = scalar_lea.vmem %s548_s4, 16  ;;  %s2714_s16 = smov [#allocation10]  }
  0x47   : > { %p2402_p3 = scmp.ne.s32.totalorder %s548_s4, %s2401_s15  ;;  %s2406_s28 = sshll.u32 %s2714_s16, 4  ;;  %s2407_s28 = int_to_ptr.vmem [resolvable:$false] %s2406_s28 }
  0x48   : > { %s2408_s30 = scalar_lea.vmem %s2407_s28, 32  ;;  %p2409_p8 = scmp.lt.s32.totalorder %s548_s4, %s2407_s28 }
  0x49   : > { %p2404_p4 = pnand %p2402_p3, %p2873_p10  ;;  %p2410_p11 = scmp.lt.s32.totalorder %s2408_s30, %s2401_s15 }
  0x4a   : > { %s545_s17 = scalar_lea.hbm %s3345_s6, %s2863_s23 }
  0x4b   : > { %p2405_p5 = pneg %p2404_p4  ;;  %p2411_p12 = por %p2410_p11, %p2409_p8 }
  0x4d   : > { %p2412_p13 = pnand %p2411_p12, %p2405_p5 }
  0x4f   : > { %2415 = shalt.err (!%p2412_p13)
}
  0x50   : > { %2223 = dma.hbm_to_vmem [thread:$0]  (!%p2855_p9), %s545_s17, 16, %s548_s4, %s3320_s11  }
  0x51   : > { %s3346_s8 = sld [smem:[#allocation36_spill]]  ;;  %s574_s27 = scalar_lea.vmem [#allocation13], %s2853_s20 }
  0x52   : > { %s581_s25 = sshll.u32 %s574_s27, 4  ;;  %s3322_s28 = scalar_lea.sflag [#allocation14], %s2860_s22  ;;  %s582_s25 = int_to_ptr.vmem [resolvable:$true] %s581_s25 }
  0x53   : > { %s2429_s30 = scalar_lea.vmem %s582_s25, 16  ;;  %s2715_s15 = smov [#allocation13]  }
  0x54   : > { %p2430_p0 = scmp.ne.s32.totalorder %s582_s25, %s2429_s30  ;;  %s2434_s16 = sshll.u32 %s2715_s15, 4  ;;  %s2435_s16 = int_to_ptr.vmem [resolvable:$false] %s2434_s16 }
  0x55   : > { %s2436_s2 = scalar_lea.vmem %s2435_s16, 32  ;;  %p2437_p3 = scmp.lt.s32.totalorder %s582_s25, %s2435_s16 }
  0x56   : > { %p2432_p1 = pnand %p2430_p0, %p2873_p10  ;;  %p2438_p4 = scmp.lt.s32.totalorder %s2436_s2, %s2429_s30 }
  0x57   : > { %s579_s0 = scalar_lea.hbm %s3346_s8, %s2863_s23 }
  0x58   : > { %p2433_p2 = pneg %p2432_p1  ;;  %p2439_p5 = por %p2438_p4, %p2437_p3 }
  0x5a   : > { %p2440_p8 = pnand %p2439_p5, %p2433_p2 }
  0x5c   : > { %2443 = shalt.err (!%p2440_p8)
}
  0x5d   : > { %2229 = dma.hbm_to_vmem [thread:$0]  (!%p2855_p9), %s579_s0, 16, %s582_s25, %s3322_s28  }
  0x5e   : > { %s3347_s10 = sld [smem:[#allocation37_spill]]  ;;  %s612_s24 = scalar_lea.vmem [#allocation16], %s2853_s20 }
  0x5f   : > { %s619_s27 = sshll.u32 %s612_s24, 4  ;;  %s3321_s2 = scalar_lea.sflag [#allocation17], %s2860_s22  ;;  %s620_s27 = int_to_ptr.vmem [resolvable:$true] %s619_s27 }
  0x60   : > { %s2457_s30 = scalar_lea.vmem %s620_s27, 16  ;;  %s2716_s15 = smov [#allocation16]  }
  0x61   : > { %p2458_p11 = scmp.ne.s32.totalorder %s620_s27, %s2457_s30  ;;  %s2462_s16 = sshll.u32 %s2716_s15, 4  ;;  %s2463_s16 = int_to_ptr.vmem [resolvable:$false] %s2462_s16 }
  0x62   : > { %s2464_s11 = scalar_lea.vmem %s2463_s16, 32  ;;  %p2465_p0 = scmp.lt.s32.totalorder %s620_s27, %s2463_s16 }
  0x63   : > { %p2460_p12 = pnand %p2458_p11, %p2873_p10  ;;  %p2466_p1 = scmp.lt.s32.totalorder %s2464_s11, %s2457_s30 }
  0x64   : > { %s617_s14 = scalar_lea.hbm %s3347_s10, %s2863_s23 }
  0x65   : > { %p2461_p13 = pneg %p2460_p12  ;;  %p2467_p2 = por %p2466_p1, %p2465_p0 }
  0x67   : > { %p2468_p3 = pnand %p2467_p2, %p2461_p13 }
  0x69   : > { %2471 = shalt.err (!%p2468_p3)
}
  0x6a   : > { %2235 = dma.hbm_to_vmem [thread:$0]  (!%p2855_p9), %s617_s14, 16, %s620_s27, %s3321_s2  }
  0x6b   : > { %s2938_s0 = sshll.u32 %s2853_s20, 4  ;;  %s2941_s25 = sshll.u32 %s2706_s29, 8 }
  0x6c   : > { %s3348_s1 = sld [smem:[#allocation32_spill]]  ;;  %s448_s24 = scalar_lea.vmem [#allocation2], %s2938_s0 }
  0x6d   : > { %s455_s30 = sshll.u32 %s448_s24, 4  ;;  %s445_s15 = scalar_lea.sflag [#allocation3], %s2853_s20  ;;  %s456_s30 = int_to_ptr.vmem [resolvable:$true] %s455_s30 }
  0x6e   : > { %s2485_s16 = scalar_lea.vmem %s456_s30, 256  ;;  %s2717_s14 = smov [#allocation2]  }
  0x6f   : > { %p2486_p4 = scmp.ne.s32.totalorder %s456_s30, %s2485_s16  ;;  %s2490_s27 = sshll.u32 %s2717_s14, 4  ;;  %s2491_s27 = int_to_ptr.vmem [resolvable:$false] %s2490_s27 }
  0x70   : > { %s2492_s2 = scalar_lea.vmem %s2491_s27, 512  ;;  %p2493_p11 = scmp.lt.s32.totalorder %s456_s30, %s2491_s27 }
  0x71   : > { %p2488_p5 = pnand %p2486_p4, %p2873_p10  ;;  %p2494_p12 = scmp.lt.s32.totalorder %s2492_s2, %s2485_s16 }
  0x72   : > { %s454_s17 = scalar_lea.hbm %s3348_s1, %s2941_s25 }
  0x73   : > { %p2489_p8 = pneg %p2488_p5  ;;  %p2495_p13 = por %p2494_p12, %p2493_p11 }
  0x75   : > { %p2496_p0 = pnand %p2495_p13, %p2489_p8 }
  0x77   : > { %2499 = shalt.err (!%p2496_p0)
}
  0x78   : > { %s2718_s4 = smov 64   ;;  %s2719_s11 = smov 4  }
  0x79   : > { %2208 = dma.hbm_to_vmem [thread:$0]  (!%p2855_p9), %s454_s17, 256, %s456_s30, %s445_s15, %s2718_s4, %s2718_s4, %s2719_s11  }
  0x7a   : > { %s492_s27 = scalar_lea.hbm %s3299_s3, %s2941_s25  ;;  %s486_s2 = scalar_lea.vmem [#allocation6], %s2938_s0 }
  0x7b   : > { %s493_s16 = sshll.u32 %s486_s2, 4  ;;  %s528_s6 = scalar_lea.hbm %s3301_s5, %s2863_s23  ;;  %s494_s16 = int_to_ptr.vmem [resolvable:$true] %s493_s16 }
  0x7c   : > { %s2513_s8 = scalar_lea.vmem %s494_s16, 256  ;;  %s2720_s10 = smov [#allocation6]  }
  0x7d   : > { %p2514_p1 = scmp.ne.s32.totalorder %s494_s16, %s2513_s8  ;;  %s2518_s29 = sshll.u32 %s2720_s10, 4  ;;  %s2519_s29 = int_to_ptr.vmem [resolvable:$false] %s2518_s29 }
  0x7e   : > { %s2520_s17 = scalar_lea.vmem %s2519_s29, 512  ;;  %p2521_p4 = scmp.lt.s32.totalorder %s494_s16, %s2519_s29 }
  0x7f   : > { %p2516_p2 = pnand %p2514_p1, %p2873_p10  ;;  %p2522_p5 = scmp.lt.s32.totalorder %s2520_s17, %s2513_s8 }
  0x81   : > { %p2517_p3 = pneg %p2516_p2  ;;  %p2523_p8 = por %p2522_p5, %p2521_p4 }
  0x83   : > { %p2524_p11 = pnand %p2523_p8, %p2517_p3 }
  0x85   : > { %2527 = shalt.err (!%p2524_p11)
}
  0x86   : > { %s3349_s1 = scalar_lea.sflag [#allocation5], %s2860_s22  ;;  %s523_s28 = scalar_lea.vmem [#allocation9], %s2853_s20 }
  0x87   : > { %2214 = dma.hbm_to_vmem [thread:$0]  (!%p2855_p9), %s492_s27, 256, %s494_s16, %s3349_s1, %s2718_s4, %s2718_s4, %s2719_s11  }
  0x88   : > { %s530_s10 = sshll.u32 %s523_s28, 4  ;;  %s562_s8 = scalar_lea.hbm %s3303_s7, %s2863_s23  ;;  %s531_s10 = int_to_ptr.vmem [resolvable:$true] %s530_s10 }
  0x89   : > { %s2541_s15 = scalar_lea.vmem %s531_s10, 16  ;;  %s2721_s24 = smov [#allocation9]  }
  0x8a   : > { %p2542_p12 = scmp.ne.s32.totalorder %s531_s10, %s2541_s15  ;;  %s2546_s14 = sshll.u32 %s2721_s24, 4  ;;  %s2547_s14 = int_to_ptr.vmem [resolvable:$false] %s2546_s14 }
  0x8b   : > { %s2548_s2 = scalar_lea.vmem %s2547_s14, 32  ;;  %p2549_p1 = scmp.lt.s32.totalorder %s531_s10, %s2547_s14 }
  0x8c   : > { %p2544_p13 = pnand %p2542_p12, %p2873_p10  ;;  %p2550_p2 = scmp.lt.s32.totalorder %s2548_s2, %s2541_s15 }
  0x8e   : > { %p2545_p0 = pneg %p2544_p13  ;;  %p2551_p3 = por %p2550_p2, %p2549_p1 }
  0x90   : > { %p2552_p4 = pnand %p2551_p3, %p2545_p0 }
  0x92   : > { %2555 = shalt.err (!%p2552_p4)
}
  0x93   : > { %s3350_s27 = scalar_lea.sflag [#allocation8], %s2860_s22  ;;  %s557_s1 = scalar_lea.vmem [#allocation12], %s2853_s20 }
  0x94   : > { %2220 = dma.hbm_to_vmem [thread:$0]  (!%p2855_p9), %s528_s6, 16, %s531_s10, %s3350_s27  }
  0x95   : > { %s564_s28 = sshll.u32 %s557_s1, 4  ;;  %s598_s15 = scalar_lea.hbm %s3305_s9, %s2941_s25  ;;  %s565_s28 = int_to_ptr.vmem [resolvable:$true] %s564_s28 }
  0x96   : > { %s2569_s24 = scalar_lea.vmem %s565_s28, 16  ;;  %s2722_s14 = smov [#allocation12]  }
  0x97   : > { %p2570_p5 = scmp.ne.s32.totalorder %s565_s28, %s2569_s24  ;;  %s2574_s2 = sshll.u32 %s2722_s14, 4  ;;  %s2575_s2 = int_to_ptr.vmem [resolvable:$false] %s2574_s2 }
  0x98   : > { %s2576_s16 = scalar_lea.vmem %s2575_s2, 32  ;;  %p2577_p12 = scmp.lt.s32.totalorder %s565_s28, %s2575_s2 }
  0x99   : > { %p2572_p8 = pnand %p2570_p5, %p2873_p10  ;;  %p2578_p13 = scmp.lt.s32.totalorder %s2576_s16, %s2569_s24 }
  0x9b   : > { %p2573_p11 = pneg %p2572_p8  ;;  %p2579_p0 = por %p2578_p13, %p2577_p12 }
  0x9d   : > { %p2580_p1 = pnand %p2579_p0, %p2573_p11 }
  0x9f   : > { %2583 = shalt.err (!%p2580_p1)
}
  0xa0   : > { %s3351_s6 = scalar_lea.sflag [#allocation11], %s2860_s22  ;;  %s592_s17 = scalar_lea.vmem [#allocation15], %s2938_s0 }
  0xa1   : > { %2226 = dma.hbm_to_vmem [thread:$0]  (!%p2855_p9), %s562_s8, 16, %s565_s28, %s3351_s6  }
  0xa2   : > { %s599_s1 = sshll.u32 %s592_s17, 4  ;;  %s642_s24 = scalar_lea.hbm %s3308_s12, %s2863_s23  ;;  %s600_s1 = int_to_ptr.vmem [resolvable:$true] %s599_s1 }
  0xa3   : > { %s2597_s14 = scalar_lea.vmem %s600_s1, 256  ;;  %s2723_s2 = smov [#allocation15]  }
  0xa4   : > { %p2598_p2 = scmp.ne.s32.totalorder %s600_s1, %s2597_s14  ;;  %s2602_s16 = sshll.u32 %s2723_s2, 4  ;;  %s2603_s16 = int_to_ptr.vmem [resolvable:$false] %s2602_s16 }
  0xa5   : > { %s2604_s10 = scalar_lea.vmem %s2603_s16, 512  ;;  %p2605_p5 = scmp.lt.s32.totalorder %s600_s1, %s2603_s16 }
  0xa6   : > { %p2600_p3 = pnand %p2598_p2, %p2873_p10  ;;  %p2606_p8 = scmp.lt.s32.totalorder %s2604_s10, %s2597_s14 }
  0xa8   : > { %p2601_p4 = pneg %p2600_p3  ;;  %p2607_p11 = por %p2606_p8, %p2605_p5 }
  0xaa   : > { %p2608_p12 = pnand %p2607_p11, %p2601_p4 }
  0xac   : > { %2611 = shalt.err (!%p2608_p12)
}
  0xad   : > { %s3352_s0 = scalar_lea.sflag [#allocation14], %s2860_s22  ;;  %s637_s6 = scalar_lea.vmem [#allocation18], %s2853_s20 }
  0xae   : > { %2232 = dma.hbm_to_vmem [thread:$0]  (!%p2855_p9), %s598_s15, 256, %s600_s1, %s3352_s0, %s2718_s4, %s2718_s4, %s2719_s11  }
  0xaf   : > { %s644_s27 = sshll.u32 %s637_s6, 4  ;;  %s2724_s30 = smov [#allocation18]   ;;  %s645_s27 = int_to_ptr.vmem [resolvable:$true] %s644_s27 }
  0xb0   : > { %s2625_s17 = scalar_lea.vmem %s645_s27, 16  ;;  %s2630_s29 = sshll.u32 %s2724_s30, 4  ;;  %s2631_s29 = int_to_ptr.vmem [resolvable:$false] %s2630_s29 }
  0xb1   : > { %p2626_p13 = scmp.ne.s32.totalorder %s645_s27, %s2625_s17  ;;  %s2632_s14 = scalar_lea.vmem %s2631_s29, 32 }
  0xb2   : > { %p2633_p2 = scmp.lt.s32.totalorder %s645_s27, %s2631_s29  ;;  %p2634_p3 = scmp.lt.s32.totalorder %s2632_s14, %s2625_s17 }
  0xb3   : > { %p2628_p0 = pnand %p2626_p13, %p2873_p10 }
  0xb4   : > { %p2635_p4 = por %p2634_p3, %p2633_p2 }
  0xb5   : > { %p2629_p1 = pneg %p2628_p0 }
  0xb7   : > { %p2636_p5 = pnand %p2635_p4, %p2629_p1 }
  0xb9   : > { %2639 = shalt.err (!%p2636_p5)
}
  0xba   : > { %s3353_s20 = scalar_lea.sflag [#allocation17], %s2860_s22  ;;  %653 = sbr.rel (%p2885_p6) target bundleno = 3120 (0xc30), region = 72 }
  0xbb   : > { %2238 = dma.hbm_to_vmem [thread:$0]  (!%p2855_p9), %s642_s24, 16, %s645_s27, %s3353_s20  }
  0xbc   : > { %s3040_s19 = sand.u32 (!%p2885_p6), 1, %s2694_s26  }
  0xbd   : > { %s3043_s11 = sshll.u32 (!%p2885_p6), %s3040_s19, 4  ;;  %s656_s21 = scalar_lea.sflag (!%p2885_p6), [#allocation3], %s3040_s19 }
  0xbe   : > { %s659_s22 = scalar_lea.vmem (!%p2885_p6), [#allocation2], %s3043_s11 }
  0xbf   : > { %2665 = dma.done.wait (%p2844_p7), %s656_s21, 256  }
  0xc0   : > { %2667 = vsyncadd (%p2844_p7), %s656_s21, 4294967040  ;;  %s3354_s23 = sld [smem:[#allocation28_spill]]  ;;  %s667_s24 = scalar_lea.vmem [#allocation4], %s3040_s19 }
  0xc6   : > { %s3355_s15 = sadd.s32 4294967295, %s3354_s23  }
  0xc7   : > { %s664_s13 = sand.u32 1, %s3355_s15  }
  0xc8   : > { %s665_s1 = scalar_lea.sflag [#allocation5], %s664_s13 }
  0xc9   : > { %2669 = dma.done.wait (%p2844_p7), %s665_s1, 272  }
  0xca   : > { %2671 = vsyncadd (%p2844_p7), %s665_s1, 4294967024  ;;  %s676_s2 = scalar_lea.vmem [#allocation6], %s3043_s11  ;;  %s682_s16 = scalar_lea.sflag [#allocation8], %s664_s13 }
  0xcb   : > { %s684_s10 = scalar_lea.vmem [#allocation7], %s3040_s19 }
  0xcc   : > { %2673 = dma.done.wait (%p2844_p7), %s682_s16, 32  }
  0xcd   : > { %2675 = vsyncadd (%p2844_p7), %s682_s16, 4294967264  ;;  %s692_s0 = scalar_lea.vmem [#allocation9], %s3040_s19  ;;  %s698_s8 = scalar_lea.sflag [#allocation11], %s664_s13 }
  0xce   : > { %s700_s28 = scalar_lea.vmem [#allocation10], %s3040_s19 }
  0xcf   : > { %2677 = dma.done.wait (%p2844_p7), %s698_s8, 32  }
  0xd0   : > { %2679 = vsyncadd (%p2844_p7), %s698_s8, 4294967264  ;;  %s714_s27 = scalar_lea.sflag [#allocation14], %s664_s13 }
  0xd1   : > { %2681 = dma.done.wait (%p2844_p7), %s714_s27, 272  }
  0xd2   : > { %2683 = vsyncadd (%p2844_p7), %s714_s27, 4294967024  ;;  %s725_s30 = scalar_lea.vmem [#allocation15], %s3043_s11  ;;  %s731_s29 = scalar_lea.sflag [#allocation17], %s664_s13 }
  0xd3   : > { %2685 = dma.done.wait (%p2844_p7), %s731_s29, 32  }
  0xd4   : > { %2687 = vsyncadd (%p2844_p7), %s731_s29, 4294967264  ;;  %s3356_s20 = sld [smem:[#allocation26_spill]]  ;;  %s741_s16 = scalar_lea.vmem [#allocation18], %s3040_s19 }
  0xd5   : > { %s3357_s15 = sld [smem:[#allocation38_spill]] }
  0xda   : > { %p842_p9 = scmp.lt.s32.totalorder %s3356_s20, 1  ;;  %p2030_p10 = scmp.ne.s32.totalorder %s3356_s20, 0 }
  0xdb   : > { %s3358_s27 = sld [smem:[#allocation31_spill]] (!%p2030_p10) }
  0xdc   : > { %s843_s25 = scalar_select %p842_p9, %s3356_s20, 1 }
  0xdd   : > { %857 = sbr.rel (%p2030_p10) target bundleno = 228 (0xe4), region = 120  ;;  %s3360_s14 = sld [smem:[#allocation39_spill]] (!%p2030_p10) }
  0xde   : > { %s2068_s4 = sshll.u32 %s843_s25, 5 }
  0xdf   : > { %s3087_s1 = scalar_lea.vmem %s3357_s15, %s2068_s4 }
  0xe1   : > { %s3359_s17 = smov (!%p2030_p10), %s3358_s27 }
  0xe2   : > { %v858_v0 = vld [vmem:[%s3358_s27] sm:$0xff]  ;;  %vm860_vm0 = vcmask 261120   ;;  %v859_v1 = vld [vmem:[%s3359_s17 + $0x8] sm:$0xff] }
  0xe3   : > { %861 = vst.msk [vmem:[%s3360_s14] sm:$0xff] %vm860_vm0, %v858_v0  ;;  %862 = vst.msk [vmem:[%s3360_s14 + $0x8] sm:$0xff] %vm860_vm0, %v859_v1 }
  0xe4 PF: > { %v2298_v2 = vld [vmem:[%s659_s22 + $0x8] sm:$0xff]   ;;  %v2725_v3 = vmov 0.0   ;;  %v2299_v4 = vld [vmem:[%s659_s22] sm:$0xff]   ;;  %vm2726_vm1 = vmmov 0   ;;  %s3361_s20 = sld [smem:[#allocation39_spill]]  ;;  %vm889_vm2 = vcmask 261120   ;;  %v934_v21 = vlaneseq }
  0xe5   : > { %2099 = vmatprep.subr.bf16.mxu0 %v2725_v3  ;;  %2107 = vmatprep.subr.bf16.mxu1 %v2725_v3  ;;  %v2031_v8 = vld [vmem:[%s667_s24] ss:$0 sm:$0xff]  ;;  %s2727_s22 = smov 96   ;;  %vm944_vm3 = vcmask 130048   ;;  %vm1044_vm5 = vcmask 64512   ;;  %s2728_s24 = smov 64  }
  0xe6   : > { %2100 = vmatpush3.bf16.msra.mxu0 %v2298_v2  ;;  %2103 = vmatprep.mubr.msk.bf16.mxu0 %vm2726_vm1, %v2725_v3  ;;  %v3150_v22 = vshrl.u32 %v934_v21, 7  ;;  %v3152_v23 = vand.u32 127, %v934_v21  ;;  %s2729_s13 = smov 80   ;;  %vm1074_vm6 = vcmask 1043456   ;;  %s2730_s8 = smov 112   ;;  %vm1619_vm7 = vcmask 523264  }
  0xe7   : > { %2101 = vmatprep.subr.bf16.mxu0 %v2725_v3  ;;  %2109 = vmatprep.mubr.msk.bf16.mxu1 %vm2726_vm1, %v2725_v3  ;;  %s2731_s27 = smov 48   ;;  %s2732_s18 = smov 16  }
  0xe8   : > { %vm938_vm4 = vcmp.le.s32.totalorder %v3152_v23, %v3150_v22  ;;  %s3362_s11 = scalar_lea.vmem [#allocation16], %s3040_s19 }
  0xea   : > { %v3114_v5 = vld [vmem:[%s3361_s20] sm:$0xff]  ;;  %v3119_v6 = vld [vmem:[%s3361_s20 + $0x8] sm:$0xff]  ;;  %2102 = vmatpush3.bf16.msra.mxu0 %v2299_v4 }
  0xeb   : > { %v865_v7 = vpack.c.bf16 %v3119_v6, %v3114_v5  ;;  %2113 = vmatprep.subr.bf16.mxu0 %v2725_v3 }
  0xed   : > { %2104 = vmatmul.mubr.msk.bf16.vlgmr.msra.gmra.mxu0 %vm889_vm2, %v865_v7 }
  0xee   : > { %2115 = vmatprep.mubr.msk.bf16.mxu0 %vm2726_vm1, %v2725_v3 }
 0x1ad   : > { %v927_v9 = vpop.f32.mrf.mxu0 }
 0x1ae   : > { %v928_v10 = vadd.f32 %v2031_v8, %v927_v9 }
 0x1af   : > { %v2105_v11 = vpop.f32.mrf.mxu0 }
 0x1b0   : > { %v3132_v12 = vpack.c.bf16 %v928_v10, %v928_v10 }
 0x1b1   : > { %v930_v13 = vpop.f32.mrf.mxu0 }
 0x1b2   : > { %v931_v14 = vadd.f32 %v2031_v8, %v930_v13  ;;  %942 = vrot.lane.b32.xlu0 %v3132_v12, %s2727_s22 }
 0x1b3   : > { %v2106_v15 = vpop.f32.mrf.mxu0 }
 0x1b4   : > { %v3135_v16 = vpack.c.bf16 %v931_v14, %v931_v14 }
 0x1b6   : > { %992 = vrot.lane.b32.xlu0 %v3135_v16, %s2727_s22 }
 0x224   : > { %v943_v17 = vpop.permute.xlu0 %942 }
 0x225   : > { %v949_v18 = vsel %vm944_vm3, %v943_v17, 0 }
 0x226   : > { %2108 = vmatpush3.bf16.xpose.msra.mxu1 %v949_v18 }
 0x227   : > { %2119 = vmatprep.subr.bf16.mxu1 %v2725_v3 }
 0x228   : > { %v993_v19 = vpop.permute.xlu0 %992 }
 0x229   : > { %v998_v20 = vsel %vm944_vm3, %v993_v19, 0 }
 0x22a   : > { %2114 = vmatpush3.bf16.xpose.msra.mxu0 %v998_v20 }
 0x22b   : > { %2125 = vmatprep.subr.bf16.mxu0 %v2725_v3 }
 0x22d   : > { %2110 = vmatmul.mubr.msk.bf16.vlgmr.msra.gmra.mxu1 %vm944_vm3, %v3132_v12 }
 0x22e   : > { %2121 = vmatprep.mubr.msk.bf16.mxu1 %vm2726_vm1, %v2725_v3 }
 0x231   : > { %2116 = vmatmul.mubr.msk.bf16.vlgmr.msra.gmra.mxu0 %vm944_vm3, %v3135_v16 }
 0x232   : > { %2127 = vmatprep.mubr.msk.bf16.mxu0 %vm2726_vm1, %v2725_v3 }
 0x2ed   : > { %v985_v24 = vpop.f32.mrf.mxu1 }
 0x2ee   : > { %v1042_v25 = vsel %vm938_vm4, %v985_v24, -1e+30 }
 0x2ef   : > { %v2111_v26 = vpop.f32.mrf.mxu1  ;;  %v1045_v27 = vsel %vm1044_vm5, %v1042_v25, -inf }
 0x2f0   : > { %1046 = vmax.xlane.f32.xlu1 %v1045_v27 }
 0x2f1   : > { %v988_v28 = vpop.f32.mrf.mxu1  ;;  %v1034_v29 = vpop.f32.mrf.mxu0 }
 0x2f2   : > { %v1043_v30 = vsel %vm938_vm4, %v1034_v29, -1e+30 }
 0x2f3   : > { %v2112_v31 = vpop.f32.mrf.mxu1  ;;  %v2117_v32 = vpop.f32.mrf.mxu0  ;;  %v1048_v33 = vsel %vm1044_vm5, %v1043_v30, -inf }
 0x2f4   : > { %1049 = vmax.xlane.f32.xlu1 %v1048_v33 }
 0x2f5   : > { %v1037_v34 = vpop.f32.mrf.mxu0 }
 0x2f7   : > { %v2118_v35 = vpop.f32.mrf.mxu0 }
 0x305   : > { %1069 = vrot.lane.b32.xlu1 %v3132_v12, %s2728_s24 }
 0x309   : > { %1118 = vrot.lane.b32.xlu1 %v3135_v16, %s2728_s24 }
 0x30d   : > { %1169 = vrot.lane.b32.xlu1 %v3132_v12, %s2729_s13 }
 0x379   : > { %v1047_v36 = vpop.xlane.xlu1 %1046 }
 0x37a   : > { %v1051_v37 = vsub.f32 %v1042_v25, %v1047_v36 }
 0x37c   : > { %v1053_v38 = vmul.f32 1.442695, %v1051_v37 }
 0x37d   : > { %v1050_v39 = vpop.xlane.xlu1 %1049 }
 0x37e   : > { %2308 = vpow2.f32 %v1053_v38  ;;  %v1052_v40 = vsub.f32 %v1043_v30, %v1050_v39 }
 0x380   : > { %v1055_v41 = vmul.f32 1.442695, %v1052_v40 }
 0x381   : > { %v1070_v42 = vpop.permute.xlu1 %1069 }
 0x382   : > { %2310 = vpow2.f32 %v1055_v41  ;;  %v1076_v43 = vsel %vm1074_vm6, %v1070_v42, 0 }
 0x383   : > { %2120 = vmatpush3.bf16.msra.mxu1 %v1076_v43 }
 0x384   : > { %2131 = vmatprep.subr.bf16.mxu1 %v2725_v3 }
 0x385   : > { %v1119_v44 = vpop.permute.xlu1 %1118 }
 0x386   : > { %v1124_v45 = vsel %vm1074_vm6, %v1119_v44, 0 }
 0x387   : > { %2126 = vmatpush3.bf16.msra.mxu0 %v1124_v45 }
 0x388   : > { %2137 = vmatprep.subr.bf16.mxu0 %v2725_v3 }
 0x389   : > { %v1170_v50 = vpop.permute.xlu1 %1169 }
 0x38a   : > { %v1175_v57 = vsel %vm944_vm3, %v1170_v50, 0 }
 0x38b   : > { %v2309_v46 = vpop.eup %2308 }
 0x38c   : > { %v1057_v47 = vsel %vm1044_vm5, %v2309_v46, 0.0 }
 0x38d   : > { %1058 = vadd.xlane.f32.xlu0 %v1057_v47  ;;  %v2301_v47 = vld [vmem:[%s676_s2] sm:$0xff]  }
 0x38f   : > { %v2311_v48 = vpop.eup %2310 }
 0x390   : > { %v1060_v49 = vsel %vm1044_vm5, %v2311_v48, 0.0 }
 0x391   : > { %1061 = vadd.xlane.f32.xlu1 %v1060_v49 }
 0x3a2   : > { %1219 = vrot.lane.b32.xlu1 %v3135_v16, %s2729_s13 }
 0x3a3   : > { %1167 = vrot.lane.b32.xlu0 %v3132_v12, %s2730_s8 }
 0x3a6   : > { %1217 = vrot.lane.b32.xlu1 %v3135_v16, %s2730_s8 }
 0x416   : > { %v1059_v51 = vpop.xlane.xlu0 %1058 }
 0x417   : > { %2312 = vrcp.f32 %v1059_v51 }
 0x41a   : > { %v1062_v52 = vpop.xlane.xlu1 %1061  ;;  %v1168_v62 = vpop.permute.xlu0 %1167 }
 0x41b   : > { %2314 = vrcp.f32 %v1062_v52 }
 0x41e   : > { %v1220_v59 = vpop.permute.xlu1 %1219 }
 0x41f   : > { %v1225_v61 = vsel %vm944_vm3, %v1220_v59, 0  ;;  %v2043_v59 = vld [vmem:[%s684_s10] ss:$0 sm:$0xff]  ;;  %s3364_s10 = scalar_lea.vmem [#allocation13], %s3040_s19 }
 0x422   : > { %v1218_v63 = vpop.permute.xlu1 %1217 }
 0x424   : > { %v2313_v53 = vpop.eup %2312 }
 0x425   : > { %v1065_v54 = vmul.f32 %v2313_v53, %v2309_v46  ;;  %v2300_v46 = vld [vmem:[%s676_s2 + $0x8] sm:$0xff]   ;;  %s3363_s2 = scalar_lea.vmem [#allocation12], %s3040_s19 }
 0x427   : > { %v1067_v55 = vpack.c.bf16 %v1065_v54, %v1065_v54 }
 0x428   : > { %v2315_v56 = vpop.eup %2314 }
 0x429   : > { %2122 = vmatmul.mubr.msk.bf16.vlgmr.msra.gmra.mxu1 %vm1044_vm5, %v1067_v55  ;;  %v1066_v58 = vmul.f32 %v2315_v56, %v2311_v48 }
 0x42a   : > { %2132 = vmatpush3.bf16.xpose.msra.mxu1 %v1175_v57  ;;  %2133 = vmatprep.mubr.msk.bf16.mxu1 %vm2726_vm1, %v2725_v3 }
 0x42b   : > { %v1068_v60 = vpack.c.bf16 %v1066_v58, %v1066_v58  ;;  %2143 = vmatprep.subr.bf16.mxu1 %v2725_v3 }
 0x42d   : > { %2128 = vmatmul.mubr.msk.bf16.vlgmr.msra.gmra.mxu0 %vm1044_vm5, %v1068_v60 }
 0x42e   : > { %2138 = vmatpush3.bf16.xpose.msra.mxu0 %v1225_v61  ;;  %2139 = vmatprep.mubr.msk.bf16.mxu0 %vm2726_vm1, %v2725_v3 }
 0x42f   : > { %2149 = vmatprep.subr.bf16.mxu0 %v2725_v3 }
 0x431   : > { %2134 = vmatmul.mubr.msk.bf16.vlgmr.msra.gmra.mxu1 %vm944_vm3, %v1168_v62 }
 0x432   : > { %2145 = vmatprep.mubr.msk.bf16.mxu1 %vm2726_vm1, %v2725_v3 }
 0x435   : > { %2140 = vmatmul.mubr.msk.bf16.vlgmr.msra.gmra.mxu0 %vm944_vm3, %v1218_v63 }
 0x436   : > { %2151 = vmatprep.mubr.msk.bf16.mxu0 %vm2726_vm1, %v2725_v3 }
 0x4e9   : > { %v3192_v0 = vpop.f32.mrf.mxu1 }
 0x4eb   : > { %v2123_v1 = vpop.f32.mrf.mxu1 }
 0x4ed   : > { %v1115_v2 = vpop.f32.mrf.mxu1  ;;  %v3194_v4 = vpop.f32.mrf.mxu0 }
 0x4ee   : > { %v1166_v7 = vpack.c.bf16 %v3194_v4, %v3192_v0 }
 0x4ef   : > { %v2124_v8 = vpop.f32.mrf.mxu1  ;;  %v2129_v9 = vpop.f32.mrf.mxu0 }
 0x4f1   : > { %v1163_v10 = vpop.f32.mrf.mxu0  ;;  %v1211_v11 = vpop.f32.mrf.mxu1 }
 0x4f2   : > { %v1267_v13 = vsel %vm938_vm4, %v1211_v11, -1e+30 }
 0x4f3   : > { %v2130_v14 = vpop.f32.mrf.mxu0  ;;  %v2135_v15 = vpop.f32.mrf.mxu1  ;;  %v1269_v17 = vsel %vm1044_vm5, %v1267_v13, -inf }
 0x4f4   : > { %1270 = vmax.xlane.f32.xlu1 %v1269_v17 }
 0x4f5   : > { %v1214_v18 = vpop.f32.mrf.mxu1  ;;  %v1261_v19 = vpop.f32.mrf.mxu0 }
 0x4f6   : > { %v1268_v20 = vsel %vm938_vm4, %v1261_v19, -1e+30 }
 0x4f7   : > { %v2136_v21 = vpop.f32.mrf.mxu1  ;;  %v2141_v24 = vpop.f32.mrf.mxu0  ;;  %v1272_v25 = vsel %vm1044_vm5, %v1268_v20, -inf }
 0x4f8   : > { %1273 = vmax.xlane.f32.xlu0 %v1272_v25  ;;  %v2304_v21 = vld [vmem:[%s3087_s1 + $0x18] sm:$0xff]  }
 0x4f9   : > { %v1264_v26 = vpop.f32.mrf.mxu0 }
 0x4fb   : > { %v2142_v27 = vpop.f32.mrf.mxu0 }
 0x50e   : > { %1341 = vrot.lane.b32.xlu0 %v3135_v16, %s2731_s27 }
 0x57d   : > { %v1271_v28 = vpop.xlane.xlu1 %1270 }
 0x57e   : > { %v1275_v29 = vsub.f32 %v1267_v13, %v1271_v28 }
 0x580   : > { %v1277_v30 = vmul.f32 1.442695, %v1275_v29 }
 0x581   : > { %v1274_v31 = vpop.xlane.xlu0 %1273 }
 0x582   : > { %2316 = vpow2.f32 %v1277_v30  ;;  %v1276_v32 = vsub.f32 %v1268_v20, %v1274_v31  ;;  %v2303_v20 = vld [vmem:[%s725_s30] sm:$0xff]  }
 0x584   : > { %v1279_v33 = vmul.f32 1.442695, %v1276_v32  ;;  %v2047_v32 = vld [vmem:[%s692_s0] ss:$0 sm:$0xff] }
 0x585   : > { %v1342_v34 = vpop.permute.xlu0 %1341 }
 0x586   : > { %2318 = vpow2.f32 %v1279_v33  ;;  %v1347_v22 = vsel %vm1074_vm6, %v1342_v34, 0 }
 0x587   : > { %2150 = vmatpush3.bf16.msra.mxu0 %v1347_v22 }
 0x588   : > { %2163 = vmatprep.subr.bf16.mxu0 %v2725_v3 }
 0x58f   : > { %v2317_v23 = vpop.eup %2316 }
 0x590   : > { %v1281_v35 = vsel %vm1044_vm5, %v2317_v23, 0.0 }
 0x591   : > { %1282 = vadd.xlane.f32.xlu1 %v1281_v35 }
 0x593   : > { %v2319_v36 = vpop.eup %2318 }
 0x594   : > { %v1284_v16 = vsel %vm1044_vm5, %v2319_v36, 0.0 }
 0x595   : > { %1285 = vadd.xlane.f32.xlu1 %v1284_v16 }
 0x5a6   : > { %1293 = vrot.lane.b32.xlu1 %v3132_v12, %s2731_s27 }
 0x61a   : > { %v1283_v37 = vpop.xlane.xlu1 %1282 }
 0x61b   : > { %2320 = vrcp.f32 %v1283_v37 }
 0x61e   : > { %v1286_v38 = vpop.xlane.xlu1 %1285 }
 0x61f   : > { %2322 = vrcp.f32 %v1286_v38  ;;  %v2305_v38 = vld [vmem:[%s3087_s1 + $0x10] sm:$0xff]  }
 0x622   : > { %v1294_v39 = vpop.permute.xlu1 %1293 }
 0x623   : > { %v1299_v40 = vsel %vm1074_vm6, %v1294_v39, 0  ;;  %v2306_v39 = vld [vmem:[%s3087_s1 + $0x8] sm:$0xff]  }
 0x624   : > { %2144 = vmatpush3.bf16.msra.mxu1 %v1299_v40  ;;  %v2307_v40 = vld [vmem:[%s3087_s1] sm:$0xff]  }
 0x625   : > { %2155 = vmatprep.subr.bf16.mxu1 %v2725_v3 }
 0x628   : > { %v2321_v41 = vpop.eup %2320 }
 0x629   : > { %v1289_v42 = vmul.f32 %v2321_v41, %v2317_v23  ;;  %v2048_v23 = vld [vmem:[%s700_s28] ss:$0 sm:$0xff] }
 0x62a   : > { %v2049_v41 = vld [vmem:[%s3362_s11] ss:$0 sm:$0xff] }
 0x62b   : > { %v1291_v43 = vpack.c.bf16 %v1289_v42, %v1289_v42 }
 0x62c   : > { %v2323_v44 = vpop.eup %2322 }
 0x62d   : > { %2146 = vmatmul.mubr.msk.bf16.vlgmr.msra.gmra.mxu1 %vm1044_vm5, %v1291_v43  ;;  %v1290_v45 = vmul.f32 %v2323_v44, %v2319_v36 }
 0x62e   : > { %2159 = vmatprep.mubr.msk.bf16.mxu1 %vm2726_vm1, %v2725_v3  ;;  %2156 = vmatpush3.bf16.msra.mxu1 %v2300_v46 }
 0x62f   : > { %v1292_v12 = vpack.c.bf16 %v1290_v45, %v1290_v45  ;;  %2157 = vmatprep.subr.bf16.mxu1 %v2725_v3 }
 0x631   : > { %2152 = vmatmul.mubr.msk.bf16.vlgmr.msra.gmra.mxu0 %vm1044_vm5, %v1292_v12 }
 0x632   : > { %2167 = vmatprep.mubr.msk.bf16.mxu0 %vm2726_vm1, %v2725_v3  ;;  %2158 = vmatpush3.bf16.msra.mxu1 %v2301_v47 }
 0x633   : > { %2171 = vmatprep.subr.bf16.mxu1 %v2725_v3 }
 0x6ed   : > { %v1335_v48 = vpop.f32.mrf.mxu1 }
 0x6ef   : > { %v2147_v49 = vpop.f32.mrf.mxu1 }
 0x6f1   : > { %v1338_v50 = vpop.f32.mrf.mxu1  ;;  %v1383_v51 = vpop.f32.mrf.mxu0 }
 0x6f2   : > { %v1389_v52 = vpack.c.bf16 %v1383_v51, %v1335_v48  ;;  %v2053_v50 = vld [vmem:[%s741_s16] ss:$0 sm:$0xff] }
 0x6f3   : > { %v2148_v53 = vpop.f32.mrf.mxu1  ;;  %v2153_v54 = vpop.f32.mrf.mxu0 }
 0x6f4   : > { %1391 = vrot.lane.b32.xlu1 %v1389_v52, %s2732_s18 }
 0x6f5   : > { %v1386_v55 = vpop.f32.mrf.mxu0 }
 0x6f7   : > { %v2154_v56 = vpop.f32.mrf.mxu0 }
 0x766   : > { %v1392_v57 = vpop.permute.xlu1 %1391 }
 0x767   : > { %v1395_v58 = vsel %vm944_vm3, %v1166_v7, %v1392_v57 }
 0x768   : > { %2160 = vmatmul.mubr.msk.bf16.vlgmr.msra.gmra.mxu1 %vm889_vm2, %v1395_v58 }
 0x769   : > { %2179 = vmatprep.mubr.msk.bf16.mxu1 %vm2726_vm1, %v2725_v3  ;;  %2172 = vmatpush3.bf16.msra.mxu1 %v2304_v21 }
 0x76a   : > { %2173 = vmatprep.subr.bf16.mxu1 %v2725_v3 }
 0x76d   : > { %2174 = vmatpush3.bf16.msra.mxu1 %v2305_v38 }
 0x76e   : > { %2175 = vmatprep.subr.bf16.mxu1 %v2725_v3 }
 0x771   : > { %2176 = vmatpush3.bf16.msra.mxu1 %v2306_v39 }
 0x772   : > { %2177 = vmatprep.subr.bf16.mxu1 %v2725_v3 }
 0x775   : > { %2178 = vmatpush3.bf16.msra.mxu1 %v2307_v40 }
 0x828   : > { %v1455_v60 = vpop.f32.mrf.mxu1 }
 0x829   : > { %v1456_v61 = vadd.f32 %v2043_v59, %v1455_v60 }
 0x82a   : > { %v2161_v62 = vpop.f32.mrf.mxu1 }
 0x82b   : > { %v1462_v63 = vadd.f32 %v1456_v61, %v3114_v5 }
 0x82c   : > { %v1458_v1 = vpop.f32.mrf.mxu1 }
 0x82d   : > { %v1459_v2 = vadd.f32 %v2043_v59, %v1458_v1  ;;  %v1466_v8 = vsel %vm889_vm2, %v1462_v63, 0.0 }
 0x82e   : > { %1467 = vadd.xlane.f32.xlu1 %v1466_v8  ;;  %v2162_v0 = vpop.f32.mrf.mxu1 }
 0x82f   : > { %v1463_v4 = vadd.f32 %v1459_v2, %v3119_v6  ;;  %v2302_v6 = vld [vmem:[%s725_s30 + $0x8] sm:$0xff]  }
 0x830   : > { %2164 = vmatpush3.bf16.msra.mxu0 %v2302_v6 }
 0x831   : > { %v1469_v7 = vsel %vm889_vm2, %v1463_v4, 0.0  ;;  %2165 = vmatprep.subr.bf16.mxu0 %v2725_v3 }
 0x832   : > { %1470 = vadd.xlane.f32.xlu0 %v1469_v7 }
 0x834   : > { %2166 = vmatpush3.bf16.msra.mxu0 %v2303_v20 }
 0x8b7   : > { %v1468_v9 = vpop.xlane.xlu1 %1467 }
 0x8b8   : > { %v1473_v10 = vmul.f32 0.03125, %v1468_v9 }
 0x8ba   : > { %v1475_v11 = vsub.f32 %v1462_v63, %v1473_v10 }
 0x8bb   : > { %v1471_v13 = vpop.xlane.xlu0 %1470 }
 0x8bc   : > { %v1474_v14 = vmul.f32 0.03125, %v1471_v13  ;;  %v1477_v5 = vmul.f32 %v1475_v11, %v1475_v11 }
 0x8be   : > { %v1476_v15 = vsub.f32 %v1463_v4, %v1474_v14  ;;  %v1479_v17 = vsel %vm889_vm2, %v1477_v5, 0.0 }
 0x8bf   : > { %1480 = vadd.xlane.f32.xlu0 %v1479_v17  ;;  %v2059_v17 = vld [vmem:[%s3363_s2] ss:$0 sm:$0xff] }
 0x8c0   : > { %v1478_v18 = vmul.f32 %v1476_v15, %v1476_v15 }
 0x8c2   : > { %v1482_v19 = vsel %vm889_vm2, %v1478_v18, 0.0 }
 0x8c3   : > { %1483 = vadd.xlane.f32.xlu1 %v1482_v19  ;;  %v2060_v19 = vld [vmem:[%s3364_s10] ss:$0 sm:$0xff] }
 0x948   : > { %v1481_v24 = vpop.xlane.xlu0 %1480 }
 0x949   : > { %v1485_v25 = vmul.f32 0.03125, %v1481_v24 }
 0x94b   : > { %v1487_v26 = vadd.f32 1e-05, %v1485_v25 }
 0x94c   : > { %v1484_v27 = vpop.xlane.xlu1 %1483 }
 0x94d   : > { %2324 = vrsqrt.f32 %v1487_v26  ;;  %v1486_v28 = vmul.f32 0.03125, %v1484_v27 }
 0x94f   : > { %v1488_v29 = vadd.f32 1e-05, %v1486_v28 }
 0x951   : > { %2326 = vrsqrt.f32 %v1488_v29 }
 0x95a   : > { %v2325_v30 = vpop.eup %2324 }
 0x95b   : > { %v1491_v31 = vmul.f32 %v2325_v30, %v1475_v11 }
 0x95d   : > { %v1499_v22 = vmul.f32 %v2047_v32, %v1491_v31 }
 0x95e   : > { %v2327_v33 = vpop.eup %2326 }
 0x95f   : > { %v1492_v34 = vmul.f32 %v2327_v33, %v1476_v15  ;;  %v1507_v36 = vadd.f32 %v2048_v23, %v1499_v22 }
 0x961   : > { %v1500_v35 = vmul.f32 %v2047_v32, %v1492_v34 }
 0x963   : > { %v1508_v16 = vadd.f32 %v2048_v23, %v1500_v35 }
 0x965   : > { %v1509_v37 = vpack.c.bf16 %v1508_v16, %v1507_v36 }
 0x967   : > { %2168 = vmatmul.mubr.msk.bf16.vlgmr.msra.gmra.mxu0 %vm889_vm2, %v1509_v37 }
 0xa27   : > { %v1570_v42 = vpop.f32.mrf.mxu0 }
 0xa28   : > { %v1571_v44 = vadd.f32 %v2049_v41, %v1570_v42 }
 0xa29   : > { %v2169_v43 = vpop.f32.mrf.mxu0 }
 0xa2a   : > { %v1577_v47 = vmax.f32 %v1571_v44, 0.0 }
 0xa2b   : > { %v1573_v45 = vpop.f32.mrf.mxu0 }
 0xa2c   : > { %v1574_v12 = vadd.f32 %v2049_v41, %v1573_v45 }
 0xa2d   : > { %v2170_v46 = vpop.f32.mrf.mxu0 }
 0xa2e   : > { %v1578_v48 = vmax.f32 %v1574_v12, 0.0 }
 0xa30   : > { %v1579_v49 = vpack.c.bf16 %v1578_v48, %v1577_v47 }
 0xa32   : > { %2180 = vmatmul.mubr.msk.bf16.vlgmr.msra.gmra.mxu1 %vm1619_vm7, %v1579_v49 }
 0xaf2   : > { %v1657_v51 = vpop.f32.mrf.mxu1 }
 0xaf3   : > { %v1658_v52 = vadd.f32 %v2053_v50, %v1657_v51 }
 0xaf4   : > { %v2181_v3 = vpop.f32.mrf.mxu1 }
 0xaf5   : > { %v1664_v53 = vadd.f32 %v1658_v52, %v1507_v36 }
 0xaf6   : > { %v1660_v54 = vpop.f32.mrf.mxu1 }
 0xaf7   : > { %v1661_v55 = vadd.f32 %v2053_v50, %v1660_v54  ;;  %v1668_v56 = vsel %vm889_vm2, %v1664_v53, 0.0 }
 0xaf8   : > { %1669 = vadd.xlane.f32.xlu0 %v1668_v56  ;;  %v2182_v57 = vpop.f32.mrf.mxu1 }
 0xaf9   : > { %v1665_v58 = vadd.f32 %v1661_v55, %v1508_v16 }
 0xafb   : > { %v1671_v59 = vsel %vm889_vm2, %v1665_v58, 0.0 }
 0xafc   : > { %1672 = vadd.xlane.f32.xlu1 %v1671_v59 }
 0xb81   : > { %v1670_v60 = vpop.xlane.xlu0 %1669 }
 0xb82   : > { %v1674_v61 = vmul.f32 0.03125, %v1670_v60 }
 0xb84   : > { %v1676_v62 = vsub.f32 %v1664_v53, %v1674_v61 }
 0xb85   : > { %v1673_v63 = vpop.xlane.xlu1 %1672 }
 0xb86   : > { %v1675_v1 = vmul.f32 0.03125, %v1673_v63  ;;  %v1678_v2 = vmul.f32 %v1676_v62, %v1676_v62 }
 0xb88   : > { %v1677_v8 = vsub.f32 %v1665_v58, %v1675_v1  ;;  %v1680_v0 = vsel %vm889_vm2, %v1678_v2, 0.0 }
 0xb89   : > { %1681 = vadd.xlane.f32.xlu0 %v1680_v0 }
 0xb8a   : > { %v1679_v4 = vmul.f32 %v1677_v8, %v1677_v8 }
 0xb8c   : > { %v1683_v7 = vsel %vm889_vm2, %v1679_v4, 0.0 }
 0xb8d   : > { %1684 = vadd.xlane.f32.xlu1 %v1683_v7 }
 0xc12   : > { %v1682_v9 = vpop.xlane.xlu0 %1681 }
 0xc13   : > { %v1686_v10 = vmul.f32 0.03125, %v1682_v9 }
 0xc15   : > { %v1688_v11 = vadd.f32 1e-05, %v1686_v10 }
 0xc16   : > { %v1685_v13 = vpop.xlane.xlu1 %1684 }
 0xc17   : > { %2328 = vrsqrt.f32 %v1688_v11  ;;  %v1687_v14 = vmul.f32 0.03125, %v1685_v13 }
 0xc19   : > { %v1689_v5 = vadd.f32 1e-05, %v1687_v14 }
 0xc1b   : > { %2330 = vrsqrt.f32 %v1689_v5 }
 0xc24   : > { %v2329_v15 = vpop.eup %2328 }
 0xc25   : > { %v1692_v18 = vmul.f32 %v2329_v15, %v1676_v62 }
 0xc27   : > { %v1700_v6 = vmul.f32 %v2059_v17, %v1692_v18 }
 0xc28   : > { %v2331_v20 = vpop.eup %2330 }
 0xc29   : > { %v1708_v21 = vadd.f32 %v2060_v19, %v1700_v6  ;;  %v1693_v24 = vmul.f32 %v2331_v20, %v1677_v8 }
 0xc2b   : > { %1710 = vst.msk [vmem:[%s3361_s20] sm:$0xff] %vm889_vm2, %v1708_v21  ;;  %v1701_v25 = vmul.f32 %v2059_v17, %v1693_v24 }
 0xc2d   : > { %v1709_v26 = vadd.f32 %v2060_v19, %v1701_v25 }
 0xc2f   : > { %1711 = vst.msk [vmem:[%s3361_s20 + $0x8] sm:$0xff] %vm889_vm2, %v1709_v26 }
 0xc30 PF: > { %s3365_s16 = sld [smem:[#allocation28_spill]]  ;;  %s3370_s25 = smov %s2694_s26 }
 0xc31   : > { %s3366_s19 = sld [smem:[#allocation25_spill]] }
 0xc32   : > { %s3367_s27 = sld [smem:[#allocation30_spill]] }
 0xc33   : > { %s3368_s28 = sld [smem:[#allocation27_spill]] }
 0xc34   : > { %s3369_s29 = sld [smem:[#allocation29_spill]] }
 0xc36   : > { %s41_s30 = sadd.s32 1, %s3365_s16  }
 0xc37   : > { %p38_p7 = scmp.ge.s32.totalorder %s41_s30, 4   ;;  %s3371_s26 = smov %s3366_s19 }
 0xc39   :  { %40 = sbr.rel (!%p38_p7) target bundleno = 24 (0x18), region = 242 }
 0xc3e   :  { %1734 = vsyncpa [#allocation3], 1 }
 0xc3f   :  { %1736 = vsyncpa [#allocation3 + $0x1], 1 }
 0xc40   :  { %1737 = vsyncpa [#allocation5], 1 }
 0xc41   :  { %1739 = vsyncpa [#allocation5 + $0x1], 1 }
 0xc42   :  { %1740 = vsyncpa [#allocation8], 1 }
 0xc43   :  { %1742 = vsyncpa [#allocation8 + $0x1], 1 }
 0xc44   :  { %1743 = vsyncpa [#allocation11], 1 }
 0xc45   :  { %1745 = vsyncpa [#allocation11 + $0x1], 1 }
 0xc46   :  { %1746 = vsyncpa [#allocation14], 1 }
 0xc47   :  { %1748 = vsyncpa [#allocation14 + $0x1], 1 }
 0xc48   :  { %1749 = vsyncpa [#allocation17], 1 }
 0xc49   :  { %1751 = vsyncpa [#allocation17 + $0x1], 1 }

</bundles_post_ra>
